<compile_context>
chip_gen: v7x
topology: tpu7x:2x2x1
jax: 0.10.0
libtpu: 0.0.40
codegen_flags: <defaults>
</compile_context>

<pallas_src>
import jax
import jax.numpy as jnp
from jax.experimental import pallas as pl
from jax.experimental.pallas import tpu as pltpu


def _gray_weights(C):
    if C == 3:
        return (0.2125, 0.7154, 0.0721)        # skimage rgb2gray luma weights
    return tuple(1.0 / C for _ in range(C))


# ----------------------------------------------------------------------------
# Fused forward kernel (everything on the MXU, f32 accumulation)
# ----------------------------------------------------------------------------
def _mff_kernel(
    im2col_ref,    # (B*H*W, C*9)        f32  VMEM  3x3 'same' conv patches
    x_flat_ref,    # (B, C*H*W)          f32  VMEM  flattened NCHW image
    pool_ref,      # (B, B*H*W)          bf16 VMEM  block-diag mean-pool matrix
    conv_w_ref,    # (C*9, Cout)         bf16 VMEM  conv weights (im2col layout)
    conv_b_ref,    # (1, Cout)           f32
    cls_w_ref,     # (Cout, D_cnn)       bf16 cnn classifier
    cls_b_ref,     # (1, D_cnn)          f32
    qtx_w_ref,     # (C*H*W, Hq+D_tex)   bf16 [qtn_fc1 | gray (x) tex_proj]
    qtn_b1_ref,    # (1, Hq)             f32
    qtn_w2_ref,    # (Hq, D_qtn)         bf16
    qtn_b2_ref,    # (1, D_qtn)          f32
    fc_tex_w_ref,  # (D_tex, 128)        bf16
    fc_tex_b_ref,  # (1, 128)            f32
    fus_w_ref,     # (D_cnn+D_qtn+128, 256) bf16
    fus_b_ref,     # (1, 256)            f32
    fin_w_ref,     # (256, n_cls)        bf16
    fin_b_ref,     # (1, n_cls)          f32
    out_ref,       # (B, n_cls)          f32
):
    f32, bf16 = jnp.float32, jnp.bfloat16

    # ---------- CNN branch: conv3x3 (+ReLU) + GAP + linear classifier -------
    conv = jnp.dot(im2col_ref[...].astype(bf16), conv_w_ref[...],
                   preferred_element_type=f32)                   # (B*HW, Cout)
    conv = jnp.maximum(conv + conv_b_ref[...], 0.0)              # f32 elementwise
    pooled = jnp.dot(pool_ref[...], conv.astype(bf16),
                     preferred_element_type=f32)                 # (B, Cout)
    cnn_f = jnp.dot(pooled.astype(bf16), cls_w_ref[...],
                    preferred_element_type=f32) + cls_b_ref[...]  # (B, D_cnn)

    # ---------- QTN fc1 + grayscale/texture projection: one shared MXU pass -
    xf = x_flat_ref[...].astype(bf16)                            # (B, C*H*W)
    qt = jnp.dot(xf, qtx_w_ref[...], preferred_element_type=f32)  # (B, Hq+D_tex)
    hq = qtn_b1_ref.shape[1]
    d_tex = qtx_w_ref.shape[1] - hq
    h1 = jnp.maximum(qt[:, 0:hq] + qtn_b1_ref[...], 0.0)
    qtn_f = jnp.dot(h1.astype(bf16), qtn_w2_ref[...],
                    preferred_element_type=f32) + qtn_b2_ref[...]  # (B, D_qtn)
    tex_raw = qt[:, hq:hq + d_tex]                               # (B, D_tex)
    tex_f = jnp.dot(tex_raw.astype(bf16), fc_tex_w_ref[...],
                    preferred_element_type=f32) + fc_tex_b_ref[...]  # (B, 128)

    # ---------- fusion head: concat -> fc_fusion + ReLU -> fc_final ---------
    # concat is expressed as three dots against aligned row-slices of fus_w
    # (offsets 0 / 32 / 64 are bf16 sublane-tile aligned; mathematically
    # identical to the concatenated matmul, avoids an in-kernel lane concat).
    d_cnn = cls_w_ref.shape[1]
    d_qtn = qtn_w2_ref.shape[1]
    d_t = fc_tex_w_ref.shape[1]
    w_cnn = fus_w_ref[0:d_cnn, :]
    w_qtn = fus_w_ref[d_cnn:d_cnn + d_qtn, :]
    w_tex = fus_w_ref[d_cnn + d_qtn:d_cnn + d_qtn + d_t, :]
    fused = (jnp.dot(cnn_f.astype(bf16), w_cnn, preferred_element_type=f32)
             + jnp.dot(qtn_f.astype(bf16), w_qtn, preferred_element_type=f32)
             + jnp.dot(tex_f.astype(bf16), w_tex, preferred_element_type=f32)
             + fus_b_ref[...])
    fused = jnp.maximum(fused, 0.0)
    out = jnp.dot(fused.astype(bf16), fin_w_ref[...],
                  preferred_element_type=f32) + fin_b_ref[...]
    out_ref[...] = out.astype(out_ref.dtype)


# ----------------------------------------------------------------------------
# Wrapper: one pallas_call for the whole forward
# ----------------------------------------------------------------------------
def mff_histonet_forward(kparams, x):
    B, C, H, W = x.shape
    x = x.astype(jnp.float32)

    # Layout-only prep (tiny XLA ops: pad / slice / stack, no model compute):
    #  * im2col patches so the 3x3 'same' conv runs as ONE MXU dot
    #  * flattened NCHW image for the fused qtn/texture branch
    #  * block-diagonal mean-pool matrix so GAP also runs on the MXU
    x_pad = jnp.pad(x, ((0, 0), (0, 0), (1, 1), (1, 1)))
    patches = jnp.stack(
        [x_pad[:, :, dh:dh + H, dw:dw + W] for dh in range(3) for dw in range(3)],
        axis=-1)                                                 # (B, C, H, W, 9)
    im2col = patches.transpose(0, 2, 3, 1, 4).reshape(B * H * W, C * 9)
    x_flat = x.reshape(B, C * H * W)
    pool = (jnp.repeat(jnp.eye(B, dtype=jnp.float32), H * W, axis=1)
            / float(H * W)).astype(jnp.bfloat16)                 # (B, B*H*W)

    num_classes = kparams["fin_b"].shape[1]
    vmem = pl.BlockSpec(memory_space=pltpu.MemorySpace.VMEM)

    return pl.pallas_call(
        _mff_kernel,
        out_shape=jax.ShapeDtypeStruct((B, num_classes), jnp.float32),
        in_specs=[vmem] * 17,
        out_specs=vmem,
    )(
        im2col, x_flat, pool,
        kparams["conv_w"], kparams["conv_b"],
        kparams["cls_w"], kparams["cls_b"],
        kparams["qtx_w"], kparams["qtn_b1"],
        kparams["qtn_w2"], kparams["qtn_b2"],
        kparams["fc_tex_w"], kparams["fc_tex_b"],
        kparams["fus_w"], kparams["fus_b"],
        kparams["fin_w"], kparams["fin_b"],
    )


# ----------------------------------------------------------------------------
# Parameters (PyTorch nn.Linear convention (out, in)) + one-time kernel layout
# ----------------------------------------------------------------------------
def make_params(key, c_in=3, h=16, w=16, conv_ch=8, cnn_out=32,
                qtn_hidden=64, qtn_out=32, texture_dim=38, num_classes=2):
    ks = jax.random.split(key, 9)

    def lin(k, fan_in, fan_out):
        kw, kb = jax.random.split(k)
        scale = 1.0 / jnp.sqrt(jnp.float32(fan_in))
        return (jax.random.normal(kw, (fan_out, fan_in), jnp.float32) * scale,
                jax.random.normal(kb, (fan_out,), jnp.float32) * scale)

    p = {}
    p["conv_w"] = jax.random.normal(ks[0], (conv_ch, c_in, 3, 3), jnp.float32) * 0.1
    p["conv_b"] = jax.random.normal(ks[1], (conv_ch,), jnp.float32) * 0.1
    p["cnn_cls_w"], p["cnn_cls_b"] = lin(ks[2], conv_ch, cnn_out)
    p["qtn_fc1_w"], p["qtn_fc1_b"] = lin(ks[3], c_in * h * w, qtn_hidden)
    p["qtn_fc2_w"], p["qtn_fc2_b"] = lin(ks[4], qtn_hidden, qtn_out)
    # deterministic stand-in projection for GLCM/LBP/Gabor descriptors (38-dim)
    p["tex_proj"] = jax.random.normal(ks[5], (h * w, texture_dim), jnp.float32) * (
        1.0 / jnp.sqrt(jnp.float32(h * w)))
    p["fc_texture_w"], p["fc_texture_b"] = lin(ks[6], texture_dim, 128)
    p["fc_fusion_w"], p["fc_fusion_b"] = lin(ks[7], cnn_out + qtn_out + 128, 256)
    p["fc_final_w"], p["fc_final_b"] = lin(ks[8], 256, num_classes)
    return p


def prepare_kernel_params(p):
    """One-time (outside jit) layout prep: (in,out) bf16 matmul weights, biases
    as (1, N) f32 rows, conv weights in im2col layout, and the grayscale (x)
    tex_proj weight fused + column-concatenated with qtn_fc1."""
    f32, bf16 = jnp.float32, jnp.bfloat16

    def b_row(b):
        return jnp.asarray(b, f32).reshape(1, -1)

    conv_w = jnp.asarray(p["conv_w"], f32)                    # (Cout, C, 3, 3)
    conv_ch, c_in = conv_w.shape[0], conv_w.shape[1]
    tex_proj = jnp.asarray(p["tex_proj"], f32)                # (H*W, D_tex)
    hw = tex_proj.shape[0]

    # gray_tex[c*HW + hw, t] = gray_w[c] * tex_proj[hw, t]  -> texture branch
    # shares the QTN fc1 LHS, one MXU pass yields both h1-preact and tex_raw.
    gw = jnp.asarray(_gray_weights(c_in), f32)                # (C,)
    gray_tex = (gw[:, None, None] * tex_proj[None, :, :]).reshape(c_in * hw, -1)
    qtn_w1_t = jnp.asarray(p["qtn_fc1_w"], f32).T             # (C*H*W, Hq)
    qtx_w = jnp.concatenate([qtn_w1_t, gray_tex], axis=1).astype(bf16)

    return {
        "conv_w": conv_w.reshape(conv_ch, -1).T.astype(bf16),     # (C*9, Cout)
        "conv_b": b_row(p["conv_b"]),                              # (1, Cout)
        "cls_w": jnp.asarray(p["cnn_cls_w"], f32).T.astype(bf16),  # (Cout, 32)
        "cls_b": b_row(p["cnn_cls_b"]),
        "qtx_w": qtx_w,                                            # (C*H*W, Hq+38)
        "qtn_b1": b_row(p["qtn_fc1_b"]),
        "qtn_w2": jnp.asarray(p["qtn_fc2_w"], f32).T.astype(bf16), # (Hq, 32)
        "qtn_b2": b_row(p["qtn_fc2_b"]),
        "fc_tex_w": jnp.asarray(p["fc_texture_w"], f32).T.astype(bf16),  # (38, 128)
        "fc_tex_b": b_row(p["fc_texture_b"]),
        "fus_w": jnp.asarray(p["fc_fusion_w"], f32).T.astype(bf16),      # (192, 256)
        "fus_b": b_row(p["fc_fusion_b"]),
        "fin_w": jnp.asarray(p["fc_final_w"], f32).T.astype(bf16),       # (256, 2)
        "fin_b": b_row(p["fc_final_b"]),
    }


# ----------------------------------------------------------------------------
# Pure-JAX reference (natural math: f32 conv/pool/grayscale, bf16 at the dots)
# ----------------------------------------------------------------------------
def reference_forward(params, x):
    f32, bf16 = jnp.float32, jnp.bfloat16
    B, C, H, W = x.shape
    x = x.astype(f32)

    conv = jax.lax.conv_general_dilated(
        x, params["conv_w"].astype(f32), window_strides=(1, 1), padding="SAME",
        dimension_numbers=("NCHW", "OIHW", "NCHW"))
    conv = jnp.maximum(conv + params["conv_b"][None, :, None, None], 0.0)
    pooled = jnp.mean(conv, axis=(2, 3))
    cnn_f = jnp.dot(pooled.astype(bf16),
                    jnp.asarray(params["cnn_cls_w"], f32).T.astype(bf16),
                    preferred_element_type=f32) + params["cnn_cls_b"]

    xf = x.reshape(B, -1)
    w1 = jnp.asarray(params["qtn_fc1_w"], f32).T.astype(bf16)
    h1 = jnp.maximum(jnp.dot(xf.astype(bf16), w1, preferred_element_type=f32)
                     + params["qtn_fc1_b"], 0.0)
    w2 = jnp.asarray(params["qtn_fc2_w"], f32).T.astype(bf16)
    qtn_f = jnp.dot(h1.astype(bf16), w2, preferred_element_type=f32) + params["qtn_fc2_b"]

    gw = jnp.asarray(_gray_weights(C), f32)
    gray = jnp.einsum("c,bchw->bhw", gw, x).reshape(B, H * W)
    tex_raw = jnp.dot(gray.astype(bf16), params["tex_proj"].astype(bf16),
                      preferred_element_type=f32)
    tex_f = jnp.dot(tex_raw.astype(bf16),
                    jnp.asarray(params["fc_texture_w"], f32).T.astype(bf16),
                    preferred_element_type=f32) + params["fc_texture_b"]

    comb = jnp.concatenate([cnn_f, qtn_f, tex_f], axis=1)
    fused = jnp.maximum(
        jnp.dot(comb.astype(bf16),
                jnp.asarray(params["fc_fusion_w"], f32).T.astype(bf16),
                preferred_element_type=f32) + params["fc_fusion_b"], 0.0)
    out = jnp.dot(fused.astype(bf16),
                  jnp.asarray(params["fc_final_w"], f32).T.astype(bf16),
                  preferred_element_type=f32) + params["fc_final_b"]
    return out


if __name__ == "__main__":
    key = jax.random.PRNGKey(0)
    k_param, k_x = jax.random.split(key)

    B, C, H, W = 2, 3, 16, 16
    x = jax.random.uniform(k_x, (B, C, H, W), jnp.float32)     # NCHW, like PyTorch
    params = make_params(k_param, c_in=C, h=H, w=W)
    kparams = prepare_kernel_params(params)                     # one-time layout/bf16 prep

    fwd = jax.jit(mff_histonet_forward)
    out = jax.block_until_ready(fwd(kparams, x))

    assert out.shape == (B, 2), out.shape
    assert bool(jnp.all(jnp.isfinite(out)))

    ref = reference_forward(params, x)
    assert jnp.allclose(out, ref, atol=5e-2, rtol=5e-2), (out, ref)

    print("KERNEL_OK")
</pallas_src>

<mosaic_0001>
module attributes {stable_mosaic.version = 11 : i64} {
  func.func @_mff_kernel(%arg0: memref<512x27xf32, #tpu.memory_space<vmem>>, %arg1: memref<2x768xf32, #tpu.memory_space<vmem>>, %arg2: memref<2x512xbf16, #tpu.memory_space<vmem>>, %arg3: memref<27x8xbf16, #tpu.memory_space<vmem>>, %arg4: memref<1x8xf32, #tpu.memory_space<vmem>>, %arg5: memref<8x32xbf16, #tpu.memory_space<vmem>>, %arg6: memref<1x32xf32, #tpu.memory_space<vmem>>, %arg7: memref<768x102xbf16, #tpu.memory_space<vmem>>, %arg8: memref<1x64xf32, #tpu.memory_space<vmem>>, %arg9: memref<64x32xbf16, #tpu.memory_space<vmem>>, %arg10: memref<1x32xf32, #tpu.memory_space<vmem>>, %arg11: memref<38x128xbf16, #tpu.memory_space<vmem>>, %arg12: memref<1x128xf32, #tpu.memory_space<vmem>>, %arg13: memref<192x256xbf16, #tpu.memory_space<vmem>>, %arg14: memref<1x256xf32, #tpu.memory_space<vmem>>, %arg15: memref<256x2xbf16, #tpu.memory_space<vmem>>, %arg16: memref<1x2xf32, #tpu.memory_space<vmem>>, %arg17: memref<2x2xf32, #tpu.memory_space<vmem>>) attributes {dimension_semantics = [], scalar_prefetch = 0 : i64, scratch_operands = 0 : i64, tpu.core_type = #tpu.core_type<tc>} {
    %c0 = arith.constant 0 : index
    %c0_0 = arith.constant 0 : index
    %0 = vector.load %arg0[%c0, %c0_0] : memref<512x27xf32, #tpu.memory_space<vmem>>, vector<512x27xf32>
    %1 = arith.truncf %0 : vector<512x27xf32> to vector<512x27xbf16>
    %c0_1 = arith.constant 0 : index
    %c0_2 = arith.constant 0 : index
    %2 = vector.load %arg3[%c0_1, %c0_2] : memref<27x8xbf16, #tpu.memory_space<vmem>>, vector<27x8xbf16>
    %cst = arith.constant dense<0.000000e+00> : vector<512x8xf32>
    %3 = tpu.matmul %1, %2, %cst {dimension_numbers = #tpu.dot_dimension_numbers<[1], [0], [0], [1], [0, 0, 1, 1], [], []>} : vector<512x27xbf16>, vector<27x8xbf16>, vector<512x8xf32> -> vector<512x8xf32>
    %c0_3 = arith.constant 0 : index
    %c0_4 = arith.constant 0 : index
    %4 = vector.load %arg4[%c0_3, %c0_4] : memref<1x8xf32, #tpu.memory_space<vmem>>, vector<1x8xf32>
    %5 = vector.broadcast %4 : vector<1x8xf32> to vector<512x8xf32>
    %6 = arith.addf %3, %5 : vector<512x8xf32>
    %cst_5 = arith.constant 0.000000e+00 : f32
    %7 = vector.broadcast %cst_5 : f32 to vector<512x8xf32>
    %8 = arith.maximumf %6, %7 : vector<512x8xf32>
    %c0_6 = arith.constant 0 : index
    %c0_7 = arith.constant 0 : index
    %9 = vector.load %arg2[%c0_6, %c0_7] : memref<2x512xbf16, #tpu.memory_space<vmem>>, vector<2x512xbf16>
    %10 = arith.truncf %8 : vector<512x8xf32> to vector<512x8xbf16>
    %cst_8 = arith.constant dense<0.000000e+00> : vector<2x8xf32>
    %11 = tpu.matmul %9, %10, %cst_8 {dimension_numbers = #tpu.dot_dimension_numbers<[1], [0], [0], [1], [0, 0, 1, 1], [], []>} : vector<2x512xbf16>, vector<512x8xbf16>, vector<2x8xf32> -> vector<2x8xf32>
    %12 = arith.truncf %11 : vector<2x8xf32> to vector<2x8xbf16>
    %c0_9 = arith.constant 0 : index
    %c0_10 = arith.constant 0 : index
    %13 = vector.load %arg5[%c0_9, %c0_10] : memref<8x32xbf16, #tpu.memory_space<vmem>>, vector<8x32xbf16>
    %cst_11 = arith.constant dense<0.000000e+00> : vector<2x32xf32>
    %14 = tpu.matmul %12, %13, %cst_11 {dimension_numbers = #tpu.dot_dimension_numbers<[1], [0], [0], [1], [0, 0, 1, 1], [], []>} : vector<2x8xbf16>, vector<8x32xbf16>, vector<2x32xf32> -> vector<2x32xf32>
    %c0_12 = arith.constant 0 : index
    %c0_13 = arith.constant 0 : index
    %15 = vector.load %arg6[%c0_12, %c0_13] : memref<1x32xf32, #tpu.memory_space<vmem>>, vector<1x32xf32>
    %16 = vector.broadcast %15 : vector<1x32xf32> to vector<2x32xf32>
    %17 = arith.addf %14, %16 : vector<2x32xf32>
    %c0_14 = arith.constant 0 : index
    %c0_15 = arith.constant 0 : index
    %18 = vector.load %arg1[%c0_14, %c0_15] : memref<2x768xf32, #tpu.memory_space<vmem>>, vector<2x768xf32>
    %19 = arith.truncf %18 : vector<2x768xf32> to vector<2x768xbf16>
    %c0_16 = arith.constant 0 : index
    %c0_17 = arith.constant 0 : index
    %20 = vector.load %arg7[%c0_16, %c0_17] : memref<768x102xbf16, #tpu.memory_space<vmem>>, vector<768x102xbf16>
    %cst_18 = arith.constant dense<0.000000e+00> : vector<2x102xf32>
    %21 = tpu.matmul %19, %20, %cst_18 {dimension_numbers = #tpu.dot_dimension_numbers<[1], [0], [0], [1], [0, 0, 1, 1], [], []>} : vector<2x768xbf16>, vector<768x102xbf16>, vector<2x102xf32> -> vector<2x102xf32>
    %22 = vector.extract_strided_slice %21 {offsets = [0, 0], sizes = [2, 64], strides = [1, 1]} : vector<2x102xf32> to vector<2x64xf32>
    %c0_19 = arith.constant 0 : index
    %c0_20 = arith.constant 0 : index
    %23 = vector.load %arg8[%c0_19, %c0_20] : memref<1x64xf32, #tpu.memory_space<vmem>>, vector<1x64xf32>
    %24 = vector.broadcast %23 : vector<1x64xf32> to vector<2x64xf32>
    %25 = arith.addf %22, %24 : vector<2x64xf32>
    %cst_21 = arith.constant 0.000000e+00 : f32
    %26 = vector.broadcast %cst_21 : f32 to vector<2x64xf32>
    %27 = arith.maximumf %25, %26 : vector<2x64xf32>
    %28 = arith.truncf %27 : vector<2x64xf32> to vector<2x64xbf16>
    %c0_22 = arith.constant 0 : index
    %c0_23 = arith.constant 0 : index
    %29 = vector.load %arg9[%c0_22, %c0_23] : memref<64x32xbf16, #tpu.memory_space<vmem>>, vector<64x32xbf16>
    %cst_24 = arith.constant dense<0.000000e+00> : vector<2x32xf32>
    %30 = tpu.matmul %28, %29, %cst_24 {dimension_numbers = #tpu.dot_dimension_numbers<[1], [0], [0], [1], [0, 0, 1, 1], [], []>} : vector<2x64xbf16>, vector<64x32xbf16>, vector<2x32xf32> -> vector<2x32xf32>
    %c0_25 = arith.constant 0 : index
    %c0_26 = arith.constant 0 : index
    %31 = vector.load %arg10[%c0_25, %c0_26] : memref<1x32xf32, #tpu.memory_space<vmem>>, vector<1x32xf32>
    %32 = vector.broadcast %31 : vector<1x32xf32> to vector<2x32xf32>
    %33 = arith.addf %30, %32 : vector<2x32xf32>
    %34 = vector.extract_strided_slice %21 {offsets = [0, 64], sizes = [2, 38], strides = [1, 1]} : vector<2x102xf32> to vector<2x38xf32>
    %35 = arith.truncf %34 : vector<2x38xf32> to vector<2x38xbf16>
    %c0_27 = arith.constant 0 : index
    %c0_28 = arith.constant 0 : index
    %36 = vector.load %arg11[%c0_27, %c0_28] : memref<38x128xbf16, #tpu.memory_space<vmem>>, vector<38x128xbf16>
    %cst_29 = arith.constant dense<0.000000e+00> : vector<2x128xf32>
    %37 = tpu.matmul %35, %36, %cst_29 {dimension_numbers = #tpu.dot_dimension_numbers<[1], [0], [0], [1], [0, 0, 1, 1], [], []>} : vector<2x38xbf16>, vector<38x128xbf16>, vector<2x128xf32> -> vector<2x128xf32>
    %c0_30 = arith.constant 0 : index
    %c0_31 = arith.constant 0 : index
    %38 = vector.load %arg12[%c0_30, %c0_31] : memref<1x128xf32, #tpu.memory_space<vmem>>, vector<1x128xf32>
    %39 = vector.broadcast %38 : vector<1x128xf32> to vector<2x128xf32>
    %40 = arith.addf %37, %39 : vector<2x128xf32>
    %c0_32 = arith.constant 0 : index
    %c0_33 = arith.constant 0 : index
    %41 = vector.load %arg13[%c0_32, %c0_33] : memref<192x256xbf16, #tpu.memory_space<vmem>>, vector<32x256xbf16>
    %c32 = arith.constant 32 : index
    %c0_34 = arith.constant 0 : index
    %42 = vector.load %arg13[%c32, %c0_34] : memref<192x256xbf16, #tpu.memory_space<vmem>>, vector<32x256xbf16>
    %c64 = arith.constant 64 : index
    %c0_35 = arith.constant 0 : index
    %43 = vector.load %arg13[%c64, %c0_35] : memref<192x256xbf16, #tpu.memory_space<vmem>>, vector<128x256xbf16>
    %44 = arith.truncf %17 : vector<2x32xf32> to vector<2x32xbf16>
    %cst_36 = arith.constant dense<0.000000e+00> : vector<2x256xf32>
    %45 = tpu.matmul %44, %41, %cst_36 {dimension_numbers = #tpu.dot_dimension_numbers<[1], [0], [0], [1], [0, 0, 1, 1], [], []>} : vector<2x32xbf16>, vector<32x256xbf16>, vector<2x256xf32> -> vector<2x256xf32>
    %46 = arith.truncf %33 : vector<2x32xf32> to vector<2x32xbf16>
    %cst_37 = arith.constant dense<0.000000e+00> : vector<2x256xf32>
    %47 = tpu.matmul %46, %42, %cst_37 {dimension_numbers = #tpu.dot_dimension_numbers<[1], [0], [0], [1], [0, 0, 1, 1], [], []>} : vector<2x32xbf16>, vector<32x256xbf16>, vector<2x256xf32> -> vector<2x256xf32>
    %48 = arith.addf %45, %47 : vector<2x256xf32>
    %49 = arith.truncf %40 : vector<2x128xf32> to vector<2x128xbf16>
    %cst_38 = arith.constant dense<0.000000e+00> : vector<2x256xf32>
    %50 = tpu.matmul %49, %43, %cst_38 {dimension_numbers = #tpu.dot_dimension_numbers<[1], [0], [0], [1], [0, 0, 1, 1], [], []>} : vector<2x128xbf16>, vector<128x256xbf16>, vector<2x256xf32> -> vector<2x256xf32>
    %51 = arith.addf %48, %50 : vector<2x256xf32>
    %c0_39 = arith.constant 0 : index
    %c0_40 = arith.constant 0 : index
    %52 = vector.load %arg14[%c0_39, %c0_40] : memref<1x256xf32, #tpu.memory_space<vmem>>, vector<1x256xf32>
    %53 = vector.broadcast %52 : vector<1x256xf32> to vector<2x256xf32>
    %54 = arith.addf %51, %53 : vector<2x256xf32>
    %cst_41 = arith.constant 0.000000e+00 : f32
    %55 = vector.broadcast %cst_41 : f32 to vector<2x256xf32>
    %56 = arith.maximumf %54, %55 : vector<2x256xf32>
    %57 = arith.truncf %56 : vector<2x256xf32> to vector<2x256xbf16>
    %c0_42 = arith.constant 0 : index
    %c0_43 = arith.constant 0 : index
    %58 = vector.load %arg15[%c0_42, %c0_43] : memref<256x2xbf16, #tpu.memory_space<vmem>>, vector<256x2xbf16>
    %cst_44 = arith.constant dense<0.000000e+00> : vector<2x2xf32>
    %59 = tpu.matmul %57, %58, %cst_44 {dimension_numbers = #tpu.dot_dimension_numbers<[1], [0], [0], [1], [0, 0, 1, 1], [], []>} : vector<2x256xbf16>, vector<256x2xbf16>, vector<2x2xf32> -> vector<2x2xf32>
    %c0_45 = arith.constant 0 : index
    %c0_46 = arith.constant 0 : index
    %60 = vector.load %arg16[%c0_45, %c0_46] : memref<1x2xf32, #tpu.memory_space<vmem>>, vector<1x2xf32>
    %61 = vector.broadcast %60 : vector<1x2xf32> to vector<2x2xf32>
    %62 = arith.addf %59, %61 : vector<2x2xf32>
    %c0_47 = arith.constant 0 : index
    %c0_48 = arith.constant 0 : index
    %63 = vector.load %arg17[%c0_47, %c0_48] : memref<2x2xf32, #tpu.memory_space<vmem>>, vector<2x2xf32>
    tpu.vector_store %arg17[%c0_47, %c0_48], %62 {strides = array<i32>} : memref<2x2xf32, #tpu.memory_space<vmem>>, vector<2x2xf32>,
    return
  }
}

</mosaic_0001>

<bundles_post_ra>
// kernel: mff_histonet_forward.1
= control target key start
LH: loop header
LB: loop body
LE: loop exit
PB: predicated region body
PF: predicated region fallthrough
CT: control target
= control target key end

     0   :  { %s3410_s0 = inlined_call_operand.vmem [shape: f32[512,27], index: 0, kind: input, shape index: {}]   ;;  %s3411_s1 = inlined_call_operand.vmem [shape: f32[2,768], index: 1, kind: input, shape index: {}]   ;;  %s3412_s2 = inlined_call_operand.vmem [shape: bf16[2,512], index: 2, kind: input, shape index: {}]   ;;  %s3413_s3 = inlined_call_operand.vmem [shape: bf16[27,8], index: 3, kind: input, shape index: {}]   ;;  %s3414_s4 = inlined_call_operand.vmem [shape: f32[1,8], index: 4, kind: input, shape index: {}]   ;;  %s3415_s5 = inlined_call_operand.vmem [shape: bf16[8,32], index: 5, kind: input, shape index: {}]   ;;  %s3416_s6 = inlined_call_operand.vmem [shape: f32[1,32], index: 6, kind: input, shape index: {}]   ;;  %s3417_s7 = inlined_call_operand.vmem [shape: bf16[768,102], index: 7, kind: input, shape index: {}]   ;;  %s3418_s8 = inlined_call_operand.vmem [shape: f32[1,64], index: 8, kind: input, shape index: {}]   ;;  %s3419_s9 = inlined_call_operand.vmem [shape: bf16[64,32], index: 9, kind: input, shape index: {}]   ;;  %s3420_s10 = inlined_call_operand.vmem [shape: f32[1,32], index: 10, kind: input, shape index: {}]   ;;  %s3421_s11 = inlined_call_operand.vmem [shape: bf16[38,128], index: 11, kind: input, shape index: {}]   ;;  %s3422_s12 = inlined_call_operand.vmem [shape: f32[1,128], index: 12, kind: input, shape index: {}]   ;;  %s3423_s13 = inlined_call_operand.vmem [shape: bf16[192,256], index: 13, kind: input, shape index: {}]   ;;  %s3424_s14 = inlined_call_operand.vmem [shape: f32[1,256], index: 14, kind: input, shape index: {}]   ;;  %s3425_s15 = inlined_call_operand.vmem [shape: bf16[256,2], index: 15, kind: input, shape index: {}]   ;;  %s3426_s16 = inlined_call_operand.vmem [shape: f32[1,2], index: 16, kind: input, shape index: {}]   ;;  %s3427_s17 = inlined_call_operand.hbm [shape: f32[2,2], index: 17, kind: output, shape index: {}]  }
   0x1   :  { %3430 = sst [smem:[#allocation5_spill]] %s3410_s0 }
   0x2   :  { %3431 = sst [smem:[#allocation6_spill]] %s3411_s1 }
   0x3   :  { %v2460_v0 = vld [vmem:[%s3413_s3] sm:$0xff]   ;;  %vm273_vm0 = vcmask 1044480   ;;  %v2461_v1 = vld [vmem:[%s3413_s3 + $0x8] sm:$0x3f]   ;;  %vm274_vm1 = vcmask 1045504   ;;  %s3432_s0 = sld [smem:[#allocation5_spill]] }
   0x4   :  { %2356 = vmatprep.subr.bf16.mxu0 %v2460_v0  ;;  %vm176_vm2 = vcmask 220160   ;;  %v2594_v4 = vmov 65535  }
   0x5   :  { %2357 = vmatpush3.bf16.msra.mxu0 %v2460_v0  ;;  %v275_v5 = vsel %vm273_vm0, 4294967295, %v2594_v4 }
   0x6   :  { %v276_v7 = vsel %vm274_vm1, %v275_v5, 0 }
   0x7   :  { %v278_v10 = vand.u32 %v2461_v1, %v276_v7 }
   0x9   :  { %v58_v2 = vld [vmem:[%s3432_s0] sm:$0xff]  ;;  %v59_v3 = vld [vmem:[%s3432_s0 + $0x8] sm:$0xff]  ;;  %v60_v8 = vld [vmem:[%s3432_s0 + $0x10] sm:$0xff]  ;;  %2358 = vmatprep.subr.bf16.mxu0 %v278_v10 }
   0xa   :  { %v122_v6 = vpack.c.bf16 %v59_v3, %v58_v2  ;;  %v61_v9 = vld [vmem:[%s3432_s0 + $0x18] sm:$0xff]  ;;  %v62_v11 = vld [vmem:[%s3432_s0 + $0x20] sm:$0xff]  ;;  %v63_v12 = vld [vmem:[%s3432_s0 + $0x28] sm:$0xff]  ;;  %2359 = vmatpush3.bf16.msra.mxu0 %v278_v10 }
   0xb   :  { %v123_v13 = vpack.c.bf16 %v61_v9, %v60_v8  ;;  %v124_v14 = vpack.c.bf16 %v63_v12, %v62_v11  ;;  %v64_v15 = vld [vmem:[%s3432_s0 + $0x30] sm:$0xff]  ;;  %v65_v16 = vld [vmem:[%s3432_s0 + $0x38] sm:$0xff]  ;;  %v66_v17 = vld [vmem:[%s3432_s0 + $0x40] sm:$0xff] }
   0xc   :  { %2360 = vmatprep.mubr.msk.bf16.mxu0 %vm176_vm2, %v122_v6  ;;  %v67_v18 = vld [vmem:[%s3432_s0 + $0x48] sm:$0xff]  ;;  %v125_v19 = vpack.c.bf16 %v65_v16, %v64_v15  ;;  %v68_v21 = vld [vmem:[%s3432_s0 + $0x50] sm:$0xff]  ;;  %v69_v22 = vld [vmem:[%s3432_s0 + $0x58] sm:$0xff] }
   0xd   :  { %2361 = vmatmul.mubr.msk.bf16.vlgmr.msra.gmra.mrb[0].mxu0 %vm176_vm2, %v123_v13  ;;  %v126_v20 = vpack.c.bf16 %v67_v18, %v66_v17  ;;  %v70_v23 = vld [vmem:[%s3432_s0 + $0x60] sm:$0xff]  ;;  %v71_v24 = vld [vmem:[%s3432_s0 + $0x68] sm:$0xff]  ;;  %v127_v25 = vpack.c.bf16 %v69_v22, %v68_v21  ;;  %v72_v27 = vld [vmem:[%s3432_s0 + $0x70] sm:$0xff] }
   0xe   :  { %2364 = vmatprep.mubr.msk.bf16.mxu0 %vm176_vm2, %v124_v14  ;;  %v128_v26 = vpack.c.bf16 %v71_v24, %v70_v23  ;;  %v73_v28 = vld [vmem:[%s3432_s0 + $0x78] sm:$0xff]  ;;  %v74_v29 = vld [vmem:[%s3432_s0 + $0x80] sm:$0xff]  ;;  %v75_v30 = vld [vmem:[%s3432_s0 + $0x88] sm:$0xff] }
   0xf   :  { %v129_v31 = vpack.c.bf16 %v73_v28, %v72_v27  ;;  %v130_v32 = vpack.c.bf16 %v75_v30, %v74_v29  ;;  %v76_v33 = vld [vmem:[%s3432_s0 + $0x90] sm:$0xff]  ;;  %v77_v34 = vld [vmem:[%s3432_s0 + $0x98] sm:$0xff]  ;;  %v78_v35 = vld [vmem:[%s3432_s0 + $0xa0] sm:$0xff] }
  0x10   :  { %v79_v36 = vld [vmem:[%s3432_s0 + $0xa8] sm:$0xff]  ;;  %v131_v37 = vpack.c.bf16 %v77_v34, %v76_v33  ;;  %v80_v39 = vld [vmem:[%s3432_s0 + $0xb0] sm:$0xff]  ;;  %v81_v40 = vld [vmem:[%s3432_s0 + $0xb8] sm:$0xff] }
  0x11   :  { %v132_v38 = vpack.c.bf16 %v79_v36, %v78_v35  ;;  %v82_v41 = vld [vmem:[%s3432_s0 + $0xc0] sm:$0xff]  ;;  %v83_v42 = vld [vmem:[%s3432_s0 + $0xc8] sm:$0xff]  ;;  %v133_v43 = vpack.c.bf16 %v81_v40, %v80_v39  ;;  %v84_v45 = vld [vmem:[%s3432_s0 + $0xd0] sm:$0xff] }
  0x12   :  { %v134_v44 = vpack.c.bf16 %v83_v42, %v82_v41  ;;  %v85_v46 = vld [vmem:[%s3432_s0 + $0xd8] sm:$0xff]  ;;  %v86_v47 = vld [vmem:[%s3432_s0 + $0xe0] sm:$0xff]  ;;  %v87_v48 = vld [vmem:[%s3432_s0 + $0xe8] sm:$0xff] }
  0x13   :  { %v135_v49 = vpack.c.bf16 %v85_v46, %v84_v45  ;;  %v136_v50 = vpack.c.bf16 %v87_v48, %v86_v47  ;;  %v88_v51 = vld [vmem:[%s3432_s0 + $0xf0] sm:$0xff]  ;;  %v89_v52 = vld [vmem:[%s3432_s0 + $0xf8] sm:$0xff]  ;;  %v90_v53 = vld [vmem:[%s3432_s0 + $0x100] sm:$0xff] }
  0x14   :  { %v91_v54 = vld [vmem:[%s3432_s0 + $0x108] sm:$0xff]  ;;  %v137_v55 = vpack.c.bf16 %v89_v52, %v88_v51  ;;  %v92_v57 = vld [vmem:[%s3432_s0 + $0x110] sm:$0xff]  ;;  %v93_v58 = vld [vmem:[%s3432_s0 + $0x118] sm:$0xff] }
  0x15   :  { %2365 = vmatmul.mubr.msk.bf16.gmra.mrb[4].mxu0 %vm176_vm2, %v125_v19  ;;  %v138_v56 = vpack.c.bf16 %v91_v54, %v90_v53  ;;  %v94_v59 = vld [vmem:[%s3432_s0 + $0x120] sm:$0xff]  ;;  %v95_v60 = vld [vmem:[%s3432_s0 + $0x128] sm:$0xff]  ;;  %v139_v61 = vpack.c.bf16 %v93_v58, %v92_v57  ;;  %v96_v63 = vld [vmem:[%s3432_s0 + $0x130] sm:$0xff] }
  0x16   :  { %2368 = vmatprep.mubr.msk.bf16.mxu0 %vm176_vm2, %v126_v20  ;;  %v140_v62 = vpack.c.bf16 %v95_v60, %v94_v59  ;;  %v97_v0 = vld [vmem:[%s3432_s0 + $0x138] sm:$0xff]  ;;  %v98_v1 = vld [vmem:[%s3432_s0 + $0x140] sm:$0xff]  ;;  %v99_v2 = vld [vmem:[%s3432_s0 + $0x148] sm:$0xff] }
  0x1d   :  { %2369 = vmatmul.mubr.msk.bf16.gmra.mrb[8].mxu0 %vm176_vm2, %v127_v25 }
  0x1e   :  { %2372 = vmatprep.mubr.msk.bf16.mxu0 %vm176_vm2, %v128_v26 }
  0x25   :  { %2373 = vmatmul.mubr.msk.bf16.gmra.mrb[12].mxu0 %vm176_vm2, %v129_v31 }
  0x26   :  { %2376 = vmatprep.mubr.msk.bf16.mxu0 %vm176_vm2, %v130_v32 }
  0x2d   :  { %2377 = vmatmul.mubr.msk.bf16.gmra.mrb[16].mxu0 %vm176_vm2, %v131_v37 }
  0x2e   :  { %2380 = vmatprep.mubr.msk.bf16.mxu0 %vm176_vm2, %v132_v38 }
  0x35   :  { %2381 = vmatmul.mubr.msk.bf16.gmra.mrb[20].mxu0 %vm176_vm2, %v133_v43 }
  0x36   :  { %2384 = vmatprep.mubr.msk.bf16.mxu0 %vm176_vm2, %v134_v44 }
  0x3d   :  { %2385 = vmatmul.mubr.msk.bf16.gmra.mrb[24].mxu0 %vm176_vm2, %v135_v49 }
  0x3e   :  { %2388 = vmatprep.mubr.msk.bf16.mxu0 %vm176_vm2, %v136_v50 }
  0x45   :  { %2389 = vmatmul.mubr.msk.bf16.gmra.mrb[28].mxu0 %vm176_vm2, %v137_v55 }
  0x46   :  { %2392 = vmatprep.mubr.msk.bf16.mxu0 %vm176_vm2, %v138_v56 }
  0x4d   :  { %2393 = vmatmul.mubr.msk.bf16.gmra.mrb[32].mxu0 %vm176_vm2, %v139_v61 }
  0x4e   :  { %2396 = vmatprep.mubr.msk.bf16.mxu0 %vm176_vm2, %v140_v62 }
  0x4f   :  { %22 = vsyncpa [#allocation3], 0  ;;  %v141_v3 = vpack.c.bf16 %v97_v0, %v96_v63  ;;  %v142_v4 = vpack.c.bf16 %v99_v2, %v98_v1  ;;  %v100_v5 = vld [vmem:[%s3432_s0 + $0x150] sm:$0xff]  ;;  %v101_v6 = vld [vmem:[%s3432_s0 + $0x158] sm:$0xff]  ;;  %v2595_v38 = vmov 1966171168   ;;  %v678_v40 = vlaneseq }
  0x50   :  { %v102_v7 = vld [vmem:[%s3432_s0 + $0x160] sm:$0xff]  ;;  %v103_v8 = vld [vmem:[%s3432_s0 + $0x168] sm:$0xff]  ;;  %v143_v9 = vpack.c.bf16 %v101_v6, %v100_v5  ;;  %v104_v11 = vld [vmem:[%s3432_s0 + $0x170] sm:$0xff]  ;;  %v676_v39 = vunpack.c.l.s4 %v2595_v38  ;;  %vm788_vm3 = vcmask 1043456   ;;  %vm2597_vm4 = vmmov 0   ;;  %s3433_s20 = sld [smem:[#allocation6_spill]] }
  0x51   :  { %v144_v10 = vpack.c.bf16 %v103_v8, %v102_v7  ;;  %v105_v12 = vld [vmem:[%s3432_s0 + $0x178] sm:$0xff]  ;;  %v106_v13 = vld [vmem:[%s3432_s0 + $0x180] sm:$0xff]  ;;  %v107_v14 = vld [vmem:[%s3432_s0 + $0x188] sm:$0xff]  ;;  %v2922_v42 = vshrl.u32 %v678_v40, 7  ;;  %vm784_vm5 = vcmask 64512   ;;  %vm1505_vm6 = vcmask 1042432  }
  0x52   :  { %v145_v15 = vpack.c.bf16 %v105_v12, %v104_v11  ;;  %v146_v16 = vpack.c.bf16 %v107_v14, %v106_v13  ;;  %v108_v17 = vld [vmem:[%s3432_s0 + $0x190] sm:$0xff]  ;;  %v109_v18 = vld [vmem:[%s3432_s0 + $0x198] sm:$0xff]  ;;  %v110_v19 = vld [vmem:[%s3432_s0 + $0x1a0] sm:$0xff]  ;;  %v677_v41 = vunpack.c.0.s8 %v676_v39  ;;  %s2599_s29 = smov 64   ;;  %vm1426_vm7 = vcmask 523264  }
  0x53   :  { %v111_v20 = vld [vmem:[%s3432_s0 + $0x1a8] sm:$0xff]  ;;  %v147_v21 = vpack.c.bf16 %v109_v18, %v108_v17  ;;  %v112_v23 = vld [vmem:[%s3432_s0 + $0x1b0] sm:$0xff]  ;;  %v113_v24 = vld [vmem:[%s3432_s0 + $0x1b8] sm:$0xff]  ;;  %vm1595_vm8 = vcmask 261120   ;;  %vm1501_vm9 = vcmask 310272   ;;  %vm2021_vm10 = vcmask 9216  }
  0x54   :  { %v148_v22 = vpack.c.bf16 %v111_v20, %v110_v19  ;;  %v114_v25 = vld [vmem:[%s3432_s0 + $0x1c0] sm:$0xff]  ;;  %v115_v26 = vld [vmem:[%s3432_s0 + $0x1c8] sm:$0xff]  ;;  %v149_v27 = vpack.c.bf16 %v113_v24, %v112_v23  ;;  %v116_v29 = vld [vmem:[%s3432_s0 + $0x1d0] sm:$0xff]  ;;  %v680_v45 = vsub.s32 %v677_v41, %v2922_v42 }
  0x55   :  { %2397 = vmatmul.mubr.msk.bf16.gmra.mrb[36].mxu0 %vm176_vm2, %v141_v3  ;;  %v150_v28 = vpack.c.bf16 %v115_v26, %v114_v25  ;;  %v117_v30 = vld [vmem:[%s3432_s0 + $0x1d8] sm:$0xff]  ;;  %v118_v31 = vld [vmem:[%s3432_s0 + $0x1e0] sm:$0xff]  ;;  %v119_v32 = vld [vmem:[%s3432_s0 + $0x1e8] sm:$0xff] }
  0x56   :  { %2400 = vmatprep.mubr.msk.bf16.mxu0 %vm176_vm2, %v142_v4  ;;  %v151_v33 = vpack.c.bf16 %v117_v30, %v116_v29  ;;  %v152_v34 = vpack.c.bf16 %v119_v32, %v118_v31  ;;  %v120_v35 = vld [vmem:[%s3432_s0 + $0x1f0] sm:$0xff]  ;;  %v121_v36 = vld [vmem:[%s3432_s0 + $0x1f8] sm:$0xff]  ;;  %v2072_v43 = vld.sshfl [vmem:[%s3412_s2] sm:$0x33 pattern:$0x75316420] }
  0x57   :  { %v153_v37 = vpack.c.bf16 %v121_v36, %v120_v35  ;;  %v674_v44 = vcombine.high %v2072_v43, %v2072_v43  ;;  %v2930_v47 = vrot.slane %v2072_v43, %v680_v45  ;;  %v2936_v48 = vld [vmem:[%s3414_s4] ss:$0 sm:$0xff]  ;;  %v2464_v6 = vld [vmem:[%s3417_s7 + $0xc8] sm:$0xff]  }
  0x58   :  { %v2462_v4 = vld [vmem:[%s3417_s7 + $0xc0] sm:$0xff]   ;;  %v2465_v12 = vld [vmem:[%s3417_s7 + $0x88] sm:$0xff]  }
  0x59   :  { %v2928_v46 = vrot.slane %v674_v44, %v680_v45  ;;  %v2463_v5 = vld [vmem:[%s3417_s7 + $0x80] sm:$0xff]   ;;  %2281 = vmatprep.subr.bf16.mxu0 %v2462_v4 }
  0x5a   :  { %2282 = vmatpush3.bf16.msra.mxu0 %v2463_v5 }
  0x5b   :  { %727 = vmatprep.mubr.bf16.mxu1 %v2928_v46  ;;  %2283 = vmatprep.subr.bf16.mxu0 %v2464_v6 }
  0x5d   :  { %2401 = vmatmul.mubr.msk.bf16.gmra.mrb[40].mxu0 %vm176_vm2, %v143_v9 }
  0x5e   :  { %2404 = vmatprep.mubr.msk.bf16.mxu0 %vm176_vm2, %v144_v10  ;;  %2284 = vmatpush3.bf16.msra.mxu0 %v2465_v12 }
  0x65   :  { %2405 = vmatmul.mubr.msk.bf16.gmra.mrb[44].mxu0 %vm176_vm2, %v145_v15 }
  0x66   :  { %2408 = vmatprep.mubr.msk.bf16.mxu0 %vm176_vm2, %v146_v16 }
  0x6d   :  { %2409 = vmatmul.mubr.msk.bf16.gmra.mrb[48].mxu0 %vm176_vm2, %v147_v21 }
  0x6e   :  { %2412 = vmatprep.mubr.msk.bf16.mxu0 %vm176_vm2, %v148_v22 }
  0x75   :  { %2413 = vmatmul.mubr.msk.bf16.gmra.mrb[52].mxu0 %vm176_vm2, %v149_v27 }
  0x76   :  { %2416 = vmatprep.mubr.msk.bf16.mxu0 %vm176_vm2, %v150_v28 }
  0x7d   :  { %2417 = vmatmul.mubr.msk.bf16.gmra.mrb[56].mxu0 %vm176_vm2, %v151_v33 }
  0x7e   :  { %2420 = vmatprep.mubr.msk.bf16.mxu0 %vm176_vm2, %v152_v34 }
  0x85   :  { %2421 = vmatmul.mubr.msk.bf16.gmra.mrb[60].mxu0 %vm176_vm2, %v153_v37 }
  0xe0   :  { %v2362_v49 = vpop.f32.mrb[0].mxu0 }
  0xe1   :  { %v323_v50 = vadd.f32 %v2362_v49, %v2936_v48  ;;  %v314_v51 = vpop.f32.mrb[1].mxu0 }
  0xe2   :  { %v315_v52 = vadd.f32 %v2936_v48, %v314_v51  ;;  %v2363_v53 = vpop.f32.mrb[2].mxu0 }
  0xe3   :  { %v326_v54 = vadd.f32 %v2363_v53, %v2936_v48  ;;  %v317_v55 = vpop.f32.mrb[3].mxu0  ;;  %v571_v57 = vmax.f32 %v323_v50, 0.0 }
  0xe4   :  { %v318_v56 = vadd.f32 %v2936_v48, %v317_v55  ;;  %v569_v59 = vmax.f32 %v315_v52, 0.0 }
  0xe5   :  { %v572_v58 = vmax.f32 %v326_v54, 0.0 }
  0xe6   :  { %v570_v60 = vmax.f32 %v318_v56, 0.0 }
  0xe7   :  { %v2942_v61 = vpack.c.bf16 %v572_v58, %v571_v57 }
  0xe8   :  { %v2366_v62 = vpop.f32.mrb[4].mxu0  ;;  %v2944_v63 = vpack.c.bf16 %v570_v60, %v569_v59 }
  0xe9   :  { %v339_v0 = vadd.f32 %v2366_v62, %v2936_v48  ;;  %v330_v1 = vpop.f32.mrb[5].mxu0 }
  0xea   :  { %v331_v2 = vadd.f32 %v2936_v48, %v330_v1  ;;  %v2367_v3 = vpop.f32.mrb[6].mxu0 }
  0xeb   :  { %v342_v7 = vadd.f32 %v2367_v3, %v2936_v48  ;;  %v333_v8 = vpop.f32.mrb[7].mxu0  ;;  %v575_v10 = vmax.f32 %v339_v0, 0.0 }
  0xec   :  { %v334_v9 = vadd.f32 %v2936_v48, %v333_v8  ;;  %v573_v13 = vmax.f32 %v331_v2, 0.0 }
  0xed   :  { %v576_v11 = vmax.f32 %v342_v7, 0.0 }
  0xee   :  { %v574_v14 = vmax.f32 %v334_v9, 0.0 }
  0xef   :  { %v2962_v15 = vpack.c.bf16 %v576_v11, %v575_v10 }
  0xf0   :  { %v2964_v16 = vpack.c.bf16 %v574_v14, %v573_v13  ;;  %v2370_v17 = vpop.f32.mrb[8].mxu0 }
  0xf1   :  { %v355_v18 = vadd.f32 %v2370_v17, %v2936_v48  ;;  %v346_v19 = vpop.f32.mrb[9].mxu0 }
  0xf2   :  { %v347_v20 = vadd.f32 %v2936_v48, %v346_v19  ;;  %v2371_v21 = vpop.f32.mrb[10].mxu0 }
  0xf3   :  { %v358_v22 = vadd.f32 %v2371_v21, %v2936_v48  ;;  %v349_v23 = vpop.f32.mrb[11].mxu0  ;;  %v579_v25 = vmax.f32 %v355_v18, 0.0 }
  0xf4   :  { %v350_v24 = vadd.f32 %v2936_v48, %v349_v23  ;;  %v577_v27 = vmax.f32 %v347_v20, 0.0 }
  0xf5   :  { %v580_v26 = vmax.f32 %v358_v22, 0.0 }
  0xf6   :  { %v578_v28 = vmax.f32 %v350_v24, 0.0 }
  0xf7   :  { %v2970_v29 = vpack.c.bf16 %v580_v26, %v579_v25 }
  0xf8   :  { %v2972_v30 = vpack.c.bf16 %v578_v28, %v577_v27  ;;  %v2374_v31 = vpop.f32.mrb[12].mxu0 }
  0xf9   :  { %v371_v32 = vadd.f32 %v2374_v31, %v2936_v48  ;;  %v362_v33 = vpop.f32.mrb[13].mxu0 }
  0xfa   :  { %v363_v34 = vadd.f32 %v2936_v48, %v362_v33  ;;  %v2375_v35 = vpop.f32.mrb[14].mxu0 }
  0xfb   :  { %v374_v36 = vadd.f32 %v2375_v35, %v2936_v48  ;;  %v365_v37 = vpop.f32.mrb[15].mxu0  ;;  %v583_v39 = vmax.f32 %v371_v32, 0.0 }
  0xfc   :  { %v366_v38 = vadd.f32 %v2936_v48, %v365_v37  ;;  %v581_v41 = vmax.f32 %v363_v34, 0.0 }
  0xfd   :  { %v584_v40 = vmax.f32 %v374_v36, 0.0 }
  0xfe   :  { %v582_v43 = vmax.f32 %v366_v38, 0.0 }
  0xff   :  { %v2978_v44 = vpack.c.bf16 %v584_v40, %v583_v39 }
 0x100   :  { %v2980_v45 = vpack.c.bf16 %v582_v43, %v581_v41  ;;  %v2378_v49 = vpop.f32.mrb[16].mxu0 }
 0x101   :  { %v387_v50 = vadd.f32 %v2378_v49, %v2936_v48  ;;  %v378_v51 = vpop.f32.mrb[17].mxu0 }
 0x102   :  { %v379_v52 = vadd.f32 %v2936_v48, %v378_v51  ;;  %v2379_v53 = vpop.f32.mrb[18].mxu0 }
 0x103   :  { %v390_v54 = vadd.f32 %v2379_v53, %v2936_v48  ;;  %v381_v55 = vpop.f32.mrb[19].mxu0  ;;  %v587_v57 = vmax.f32 %v387_v50, 0.0 }
 0x104   :  { %v382_v56 = vadd.f32 %v2936_v48, %v381_v55  ;;  %v585_v59 = vmax.f32 %v379_v52, 0.0 }
 0x105   :  { %v588_v58 = vmax.f32 %v390_v54, 0.0 }
 0x106   :  { %v586_v60 = vmax.f32 %v382_v56, 0.0 }
 0x107   :  { %v643_v62 = vpack.c.bf16 %v588_v58, %v587_v57 }
 0x108   :  { %v2382_v0 = vpop.f32.mrb[20].mxu0  ;;  %v642_v1 = vpack.c.bf16 %v586_v60, %v585_v59  ;;  %v690_v60 = vcombine.high %v2928_v46, %v2928_v46 }
 0x109   :  { %v403_v2 = vadd.f32 %v2382_v0, %v2936_v48  ;;  %v394_v3 = vpop.f32.mrb[21].mxu0 }
 0x10a   :  { %v395_v4 = vadd.f32 %v2936_v48, %v394_v3  ;;  %v2383_v5 = vpop.f32.mrb[22].mxu0  ;;  %2213 = vmatprep.subr.bf16.mxu1 %v642_v1 }
 0x10b   :  { %v406_v6 = vadd.f32 %v2383_v5, %v2936_v48  ;;  %v397_v7 = vpop.f32.mrb[23].mxu0  ;;  %2214 = vmatpush3.bf16.msra.mxu1 %v2944_v63  ;;  %v591_v9 = vmax.f32 %v403_v2, 0.0 }
 0x10c   :  { %v398_v8 = vadd.f32 %v2936_v48, %v397_v7  ;;  %2215 = vmatprep.subr.bf16.mxu1 %v643_v62  ;;  %v589_v11 = vmax.f32 %v395_v4, 0.0 }
 0x10d   :  { %v592_v10 = vmax.f32 %v406_v6, 0.0 }
 0x10e   :  { %v590_v12 = vmax.f32 %v398_v8, 0.0 }
 0x10f   :  { %v645_v13 = vpack.c.bf16 %v592_v10, %v591_v9  ;;  %2216 = vmatpush3.bf16.msra.mxu1 %v2942_v61 }
 0x110   :  { %v644_v14 = vpack.c.bf16 %v590_v12, %v589_v11  ;;  %v2386_v17 = vpop.f32.mrb[24].mxu0 }
 0x111   :  { %v419_v18 = vadd.f32 %v2386_v17, %v2936_v48  ;;  %v410_v19 = vpop.f32.mrb[25].mxu0 }
 0x112   :  { %v411_v20 = vadd.f32 %v2936_v48, %v410_v19  ;;  %v2387_v21 = vpop.f32.mrb[26].mxu0  ;;  %2217 = vmatprep.subr.bf16.mxu1 %v644_v14 }
 0x113   :  { %v422_v63 = vadd.f32 %v2387_v21, %v2936_v48  ;;  %v413_v22 = vpop.f32.mrb[27].mxu0  ;;  %2218 = vmatpush3.bf16.msra.mxu1 %v2964_v16  ;;  %v595_v24 = vmax.f32 %v419_v18, 0.0 }
 0x114   :  { %v414_v23 = vadd.f32 %v2936_v48, %v413_v22  ;;  %2219 = vmatprep.subr.bf16.mxu1 %v645_v13  ;;  %v593_v61 = vmax.f32 %v411_v20, 0.0 }
 0x115   :  { %v596_v25 = vmax.f32 %v422_v63, 0.0 }
 0x116   :  { %v594_v26 = vmax.f32 %v414_v23, 0.0 }
 0x117   :  { %v647_v27 = vpack.c.bf16 %v596_v25, %v595_v24  ;;  %2220 = vmatpush3.bf16.msra.mxu1 %v2962_v15 }
 0x118   :  { %v646_v28 = vpack.c.bf16 %v594_v26, %v593_v61  ;;  %v2390_v31 = vpop.f32.mrb[28].mxu0 }
 0x119   :  { %v435_v32 = vadd.f32 %v2390_v31, %v2936_v48  ;;  %v426_v33 = vpop.f32.mrb[29].mxu0 }
 0x11a   :  { %v427_v34 = vadd.f32 %v2936_v48, %v426_v33  ;;  %v2391_v35 = vpop.f32.mrb[30].mxu0  ;;  %2221 = vmatprep.subr.bf16.mxu1 %v646_v28 }
 0x11b   :  { %v438_v16 = vadd.f32 %v2391_v35, %v2936_v48  ;;  %v429_v36 = vpop.f32.mrb[31].mxu0  ;;  %2222 = vmatpush3.bf16.msra.mxu1 %v2972_v30  ;;  %v599_v38 = vmax.f32 %v435_v32, 0.0 }
 0x11c   :  { %v430_v37 = vadd.f32 %v2936_v48, %v429_v36  ;;  %2223 = vmatprep.subr.bf16.mxu1 %v647_v27  ;;  %v597_v15 = vmax.f32 %v427_v34, 0.0 }
 0x11d   :  { %v600_v39 = vmax.f32 %v438_v16, 0.0 }
 0x11e   :  { %v598_v40 = vmax.f32 %v430_v37, 0.0 }
 0x11f   :  { %v649_v41 = vpack.c.bf16 %v600_v39, %v599_v38  ;;  %2224 = vmatpush3.bf16.msra.mxu1 %v2970_v29 }
 0x120   :  { %v648_v43 = vpack.c.bf16 %v598_v40, %v597_v15  ;;  %v2394_v49 = vpop.f32.mrb[32].mxu0 }
 0x121   :  { %v451_v50 = vadd.f32 %v2394_v49, %v2936_v48  ;;  %v442_v51 = vpop.f32.mrb[33].mxu0 }
 0x122   :  { %v443_v52 = vadd.f32 %v2936_v48, %v442_v51  ;;  %v2395_v53 = vpop.f32.mrb[34].mxu0  ;;  %2225 = vmatprep.subr.bf16.mxu1 %v648_v43 }
 0x123   :  { %v454_v30 = vadd.f32 %v2395_v53, %v2936_v48  ;;  %v445_v54 = vpop.f32.mrb[35].mxu0  ;;  %2226 = vmatpush3.bf16.msra.mxu1 %v2980_v45  ;;  %v603_v56 = vmax.f32 %v451_v50, 0.0 }
 0x124   :  { %v446_v55 = vadd.f32 %v2936_v48, %v445_v54  ;;  %2227 = vmatprep.subr.bf16.mxu1 %v649_v41  ;;  %v601_v29 = vmax.f32 %v443_v52, 0.0 }
 0x125   :  { %v604_v57 = vmax.f32 %v454_v30, 0.0 }
 0x126   :  { %v602_v58 = vmax.f32 %v446_v55, 0.0 }
 0x127   :  { %v3009_v59 = vpack.c.bf16 %v604_v57, %v603_v56  ;;  %2228 = vmatpush3.bf16.msra.mxu1 %v2978_v44 }
 0x128   :  { %v3014_v62 = vpack.c.bf16 %v602_v58, %v601_v29  ;;  %v2398_v0 = vpop.f32.mrb[36].mxu0 }
 0x129   :  { %v467_v1 = vadd.f32 %v2398_v0, %v2936_v48  ;;  %v458_v45 = vpop.f32.mrb[37].mxu0 }
 0x12a   :  { %v459_v2 = vadd.f32 %v2936_v48, %v458_v45  ;;  %v2399_v3 = vpop.f32.mrb[38].mxu0  ;;  %728 = vmatmul.mubr.bf16.vlgmr.msra.gmra.mrb[0].mxu1 %v2930_v47 }
 0x12b   :  { %v470_v4 = vadd.f32 %v2399_v3, %v2936_v48  ;;  %v461_v5 = vpop.f32.mrb[39].mxu0  ;;  %767 = vmatprep.mubr.bf16.mxu1 %v690_v60  ;;  %v607_v6 = vmax.f32 %v467_v1, 0.0 }
 0x12c   :  { %v462_v44 = vadd.f32 %v2936_v48, %v461_v5  ;;  %v605_v46 = vmax.f32 %v459_v2, 0.0 }
 0x12d   :  { %v608_v7 = vmax.f32 %v470_v4, 0.0 }
 0x12e   :  { %v606_v8 = vmax.f32 %v462_v44, 0.0 }
 0x12f   :  { %v3021_v9 = vpack.c.bf16 %v608_v7, %v607_v6 }
 0x130   :  { %v3023_v10 = vpack.c.bf16 %v606_v8, %v605_v46  ;;  %v2402_v11 = vpop.f32.mrb[40].mxu0 }
 0x131   :  { %v483_v12 = vadd.f32 %v2402_v11, %v2936_v48  ;;  %v474_v13 = vpop.f32.mrb[41].mxu0 }
 0x132   :  { %v475_v14 = vadd.f32 %v2936_v48, %v474_v13  ;;  %v2403_v17 = vpop.f32.mrb[42].mxu0 }
 0x133   :  { %v486_v18 = vadd.f32 %v2403_v17, %v2936_v48  ;;  %v477_v19 = vpop.f32.mrb[43].mxu0  ;;  %v611_v21 = vmax.f32 %v483_v12, 0.0 }
 0x134   :  { %v478_v20 = vadd.f32 %v2936_v48, %v477_v19  ;;  %v609_v22 = vmax.f32 %v475_v14, 0.0 }
 0x135   :  { %v612_v63 = vmax.f32 %v486_v18, 0.0 }
 0x136   :  { %v610_v23 = vmax.f32 %v478_v20, 0.0 }
 0x137   :  { %v3029_v24 = vpack.c.bf16 %v612_v63, %v611_v21 }
 0x138   :  { %v3031_v25 = vpack.c.bf16 %v610_v23, %v609_v22  ;;  %v2406_v61 = vpop.f32.mrb[44].mxu0 }
 0x139   :  { %v499_v26 = vadd.f32 %v2406_v61, %v2936_v48  ;;  %v490_v27 = vpop.f32.mrb[45].mxu0 }
 0x13a   :  { %v491_v28 = vadd.f32 %v2936_v48, %v490_v27  ;;  %v2407_v31 = vpop.f32.mrb[46].mxu0 }
 0x13b   :  { %v502_v32 = vadd.f32 %v2407_v31, %v2936_v48  ;;  %v493_v33 = vpop.f32.mrb[47].mxu0  ;;  %v615_v35 = vmax.f32 %v499_v26, 0.0 }
 0x13c   :  { %v494_v34 = vadd.f32 %v2936_v48, %v493_v33  ;;  %v613_v36 = vmax.f32 %v491_v28, 0.0 }
 0x13d   :  { %v616_v16 = vmax.f32 %v502_v32, 0.0 }
 0x13e   :  { %v614_v37 = vmax.f32 %v494_v34, 0.0 }
 0x13f   :  { %v3037_v38 = vpack.c.bf16 %v616_v16, %v615_v35 }
 0x140   :  { %v3039_v39 = vpack.c.bf16 %v614_v37, %v613_v36  ;;  %v2410_v15 = vpop.f32.mrb[48].mxu0  ;;  %v689_v37 = vcombine.high %v2930_v47, %v2930_v47  ;;  %v2469_v47 = vld [vmem:[%s3417_s7 + $0x98] sm:$0xff]  }
 0x141   :  { %v515_v40 = vadd.f32 %v2410_v15, %v2936_v48  ;;  %v506_v41 = vpop.f32.mrb[49].mxu0 }
 0x142   :  { %v507_v43 = vadd.f32 %v2936_v48, %v506_v41  ;;  %v2411_v49 = vpop.f32.mrb[50].mxu0  ;;  %v2470_v41 = vld [vmem:[%s3417_s7 + $0xe0] sm:$0xff]  }
 0x143   :  { %v518_v50 = vadd.f32 %v2411_v49, %v2936_v48  ;;  %v509_v51 = vpop.f32.mrb[51].mxu0  ;;  %v619_v53 = vmax.f32 %v515_v40, 0.0  ;;  %v2472_v40 = vld [vmem:[%s3417_s7 + $0x40] sm:$0xff]   ;;  %v2480_v49 = vld [vmem:[%s3417_s7 + $0xe8] sm:$0xff]  }
 0x144   :  { %v510_v52 = vadd.f32 %v2936_v48, %v509_v51  ;;  %v617_v54 = vmax.f32 %v507_v43, 0.0  ;;  %v2471_v43 = vld [vmem:[%s3417_s7 + $0xa0] sm:$0xff]   ;;  %v2598_v51 = vmov 1983009808  }
 0x145   :  { %v620_v30 = vmax.f32 %v518_v50, 0.0  ;;  %v2481_v50 = vld [vmem:[%s3417_s7 + $0xa8] sm:$0xff]  }
 0x146   :  { %v618_v55 = vmax.f32 %v510_v52, 0.0  ;;  %v838_v52 = vunpack.c.l.s4 %v2598_v51  ;;  %v2509_v51 = vld [vmem:[%s3417_s7 + $0x178] sm:$0xff]  }
 0x147   :  { %v659_v56 = vpack.c.bf16 %v620_v30, %v619_v53  ;;  %v2487_v30 = vld [vmem:[%s3417_s7 + $0xf0] sm:$0xff]  }
 0x148   :  { %v658_v57 = vpack.c.bf16 %v618_v55, %v617_v54  ;;  %v2414_v29 = vpop.f32.mrb[52].mxu0  ;;  %v839_v53 = vunpack.c.0.s8 %v838_v52  ;;  %v832_v54 = vld [vmem:[%s3433_s20] sm:$0xff]  ;;  %v2489_v55 = vld [vmem:[%s3417_s7 + $0xb0] sm:$0xff]   ;;  %v2510_v52 = vld [vmem:[%s3417_s7 + $0x138] sm:$0xff]  }
 0x149   :  { %v531_v58 = vadd.f32 %v2414_v29, %v2936_v48  ;;  %v522_v60 = vpop.f32.mrb[53].mxu0 }
 0x14a   :  { %v523_v0 = vadd.f32 %v2936_v48, %v522_v60  ;;  %v2415_v1 = vpop.f32.mrb[54].mxu0  ;;  %2235 = vmatprep.subr.bf16.mxu1 %v658_v57  ;;  %v836_v57 = vcombine.high %v832_v54, %v832_v54  ;;  %v2491_v60 = vld [vmem:[%s3417_s7 + $0xf8] sm:$0xff]  }
 0x14b   :  { %v534_v45 = vadd.f32 %v2415_v1, %v2936_v48  ;;  %v525_v2 = vpop.f32.mrb[55].mxu0  ;;  %2236 = vmatpush3.bf16.msra.mxu1 %v3014_v62  ;;  %v623_v4 = vmax.f32 %v531_v58, 0.0 }
 0x14c   :  { %v526_v3 = vadd.f32 %v2936_v48, %v525_v2  ;;  %2237 = vmatprep.subr.bf16.mxu1 %v659_v56  ;;  %v621_v44 = vmax.f32 %v523_v0, 0.0  ;;  %v842_v56 = vsub.s32 %v839_v53, %v2922_v42  ;;  %v2493_v0 = vld [vmem:[%s3417_s7 + $0xb8] sm:$0xff]  }
 0x14d   :  { %v624_v5 = vmax.f32 %v534_v45, 0.0 }
 0x14e   :  { %v622_v6 = vmax.f32 %v526_v3, 0.0  ;;  %v3110_v29 = vrot.slane %v832_v54, %v842_v56  ;;  %v850_v58 = vrot.slane %v836_v57, %v842_v56 }
 0x14f   :  { %v661_v7 = vpack.c.bf16 %v624_v5, %v623_v4  ;;  %2238 = vmatpush3.bf16.msra.mxu1 %v3009_v59 }
 0x150   :  { %v660_v46 = vpack.c.bf16 %v622_v6, %v621_v44  ;;  %v2418_v8 = vpop.f32.mrb[56].mxu0  ;;  %v852_v1 = vcombine.high %v850_v58, %v850_v58  ;;  %v869_v45 = vpack.c.bf16 %v850_v58, %v850_v58  ;;  %v2512_v58 = vld [vmem:[%s3419_s9 + $0x8] sm:$0xff]  }
 0x151   :  { %v547_v11 = vadd.f32 %v2418_v8, %v2936_v48  ;;  %v538_v12 = vpop.f32.mrb[57].mxu0  ;;  %v851_v8 = vcombine.high %v3110_v29, %v3110_v29 }
 0x152   :  { %v539_v13 = vadd.f32 %v2936_v48, %v538_v12  ;;  %v2419_v14 = vpop.f32.mrb[58].mxu0  ;;  %2239 = vmatprep.subr.bf16.mxu1 %v660_v46  ;;  %v870_v2 = vpack.c.bf16 %v852_v1, %v852_v1  ;;  %v2517_v1 = vld [vmem:[%s3423_s13 + $0x4] ss:$8 sps:$4 sm:$0xff]  }
 0x153   :  { %v550_v62 = vadd.f32 %v2419_v14, %v2936_v48  ;;  %v541_v17 = vpop.f32.mrb[59].mxu0  ;;  %2240 = vmatpush3.bf16.msra.mxu1 %v3023_v10  ;;  %v627_v19 = vmax.f32 %v547_v11, 0.0 }
 0x154   :  { %v542_v18 = vadd.f32 %v2936_v48, %v541_v17  ;;  %2241 = vmatprep.subr.bf16.mxu1 %v661_v7  ;;  %v625_v59 = vmax.f32 %v539_v13, 0.0  ;;  %1329 = vmatprep.mubr.bf16.mxu0 %v870_v2  ;;  %v868_v17 = vpack.c.bf16 %v851_v8, %v851_v8  ;;  %v2522_v2 = vld [vmem:[%s3421_s11 + $0x8] sm:$0xff]  }
 0x155   :  { %v628_v20 = vmax.f32 %v550_v62, 0.0  ;;  %v2473_v62 = vld [vmem:[%s3417_s7] sm:$0xff]  }
 0x156   :  { %v626_v21 = vmax.f32 %v542_v18, 0.0 }
 0x157   :  { %v663_v63 = vpack.c.bf16 %v628_v20, %v627_v19  ;;  %2242 = vmatpush3.bf16.msra.mxu1 %v3021_v9  ;;  %v2474_v19 = vld [vmem:[%s3417_s7 + $0x48] sm:$0xff]  }
 0x158   :  { %v662_v22 = vpack.c.bf16 %v626_v21, %v625_v59  ;;  %v2422_v23 = vpop.f32.mrb[60].mxu0  ;;  %v2475_v20 = vld [vmem:[%s3417_s7 + $0x8] sm:$0xff]   ;;  %v2476_v59 = vld [vmem:[%s3417_s7 + $0x50] sm:$0xff]  }
 0x159   :  { %v563_v61 = vadd.f32 %v2422_v23, %v2936_v48  ;;  %v554_v26 = vpop.f32.mrb[61].mxu0  ;;  %v2477_v21 = vld [vmem:[%s3417_s7 + $0x10] sm:$0xff]   ;;  %v2482_v23 = vld [vmem:[%s3417_s7 + $0x60] sm:$0xff]  }
 0x15a   :  { %v555_v27 = vadd.f32 %v2936_v48, %v554_v26  ;;  %v2423_v28 = vpop.f32.mrb[62].mxu0  ;;  %2243 = vmatprep.subr.bf16.mxu1 %v662_v22  ;;  %v2479_v22 = vld [vmem:[%s3417_s7 + $0x18] sm:$0xff]   ;;  %v2484_v26 = vld [vmem:[%s3417_s7 + $0x68] sm:$0xff]  }
 0x15b   :  { %v566_v10 = vadd.f32 %v2423_v28, %v2936_v48  ;;  %v557_v31 = vpop.f32.mrb[63].mxu0  ;;  %2244 = vmatpush3.bf16.msra.mxu1 %v3031_v25  ;;  %v631_v33 = vmax.f32 %v563_v61, 0.0  ;;  %v2467_v25 = vld [vmem:[%s3417_s7 + $0x90] sm:$0xff]   ;;  %v2483_v61 = vld [vmem:[%s3417_s7 + $0x20] sm:$0xff]  }
 0x15c   :  { %v558_v32 = vadd.f32 %v2936_v48, %v557_v31  ;;  %2245 = vmatprep.subr.bf16.mxu1 %v663_v63  ;;  %v629_v9 = vmax.f32 %v555_v27, 0.0  ;;  %v2466_v48 = vld [vmem:[%s3417_s7 + $0xd0] sm:$0xff]   ;;  %v2478_v63 = vld [vmem:[%s3417_s7 + $0x58] sm:$0xff]   ;;  %v2485_v27 = vld [vmem:[%s3417_s7 + $0x28] sm:$0xff]  }
 0x15d   :  { %v632_v34 = vmax.f32 %v566_v10, 0.0  ;;  %2285 = vmatprep.subr.bf16.mxu0 %v2466_v48  ;;  %v2486_v28 = vld [vmem:[%s3417_s7 + $0x70] sm:$0xff]   ;;  %v2490_v31 = vld [vmem:[%s3417_s7 + $0x78] sm:$0xff]   ;;  %v2498_v48 = vld [vmem:[%s3417_s7 + $0x108] sm:$0xff]  }
 0x15e   :  { %v630_v35 = vmax.f32 %v558_v32, 0.0  ;;  %2286 = vmatpush3.bf16.msra.mxu0 %v2467_v25  ;;  %v2488_v10 = vld [vmem:[%s3417_s7 + $0x30] sm:$0xff]   ;;  %v2075_v32 = vld.sshfl [vmem:[%s3433_s20 + $0x8] sm:$0x33 pattern:$0x76325410] }
 0x15f   :  { %v665_v16 = vpack.c.bf16 %v632_v34, %v631_v33  ;;  %2246 = vmatpush3.bf16.msra.mxu1 %v3029_v24  ;;  %v2468_v24 = vld [vmem:[%s3417_s7 + $0xd8] sm:$0xff]   ;;  %v860_v34 = vcombine.high %v2075_v32, %v2075_v32  ;;  %v2499_v25 = vld [vmem:[%s3417_s7 + $0x150] sm:$0xff]   ;;  %v871_v53 = vpack.c.bf16 %v2075_v32, %v2075_v32 }
 0x160   :  { %v664_v36 = vpack.c.bf16 %v630_v35, %v629_v9  ;;  %2287 = vmatprep.subr.bf16.mxu0 %v2468_v24  ;;  %v2492_v33 = vld [vmem:[%s3417_s7 + $0x38] sm:$0xff]   ;;  %v2495_v9 = vld [vmem:[%s3417_s7 + $0x140] sm:$0xff]   ;;  %v867_v35 = vpack.c.bf16 %v3110_v29, %v3110_v29  ;;  %v2500_v24 = vld [vmem:[%s3417_s7 + $0x110] sm:$0xff]  }
 0x161   :  { %v2511_v29 = vld [vmem:[%s3419_s9] sm:$0xff]  }
 0x162   :  { %2247 = vmatprep.subr.bf16.mxu1 %v664_v36  ;;  %2288 = vmatpush3.bf16.msra.mxu0 %v2469_v47  ;;  %v872_v36 = vpack.c.bf16 %v860_v34, %v860_v34  ;;  %v2501_v47 = vld [vmem:[%s3417_s7 + $0x158] sm:$0xff]   ;;  %v2524_v34 = vld [vmem:[%s3423_s13 + $0x20] ss:$8 sps:$4 sm:$0xff]  }
 0x163   :  { %2248 = vmatpush3.bf16.msra.mxu1 %v3039_v39  ;;  %v2596_v39 = vmov 0.0   ;;  %2289 = vmatprep.subr.bf16.mxu0 %v2470_v41  ;;  %v2505_v41 = vld [vmem:[%s3417_s7 + $0x168] sm:$0xff]  }
 0x164   :  { %2249 = vmatprep.subr.bf16.mxu1 %v665_v16  ;;  %v2496_v16 = vld [vmem:[%s3417_s7 + $0x100] sm:$0xff]  }
 0x166   :  { %2290 = vmatpush3.bf16.msra.mxu0 %v2471_v43  ;;  %v2506_v43 = vld [vmem:[%s3417_s7 + $0x128] sm:$0xff]  }
 0x167   :  { %2250 = vmatpush3.bf16.msra.mxu1 %v3037_v38  ;;  %v776_v38 = vld [vmem:[%s3415_s5] sm:$0xf]  ;;  %2291 = vmatprep.subr.bf16.mxu0 %v2480_v49  ;;  %v2507_v49 = vld [vmem:[%s3417_s7 + $0x170] sm:$0xff]  }
 0x168   :  { %2424 = vmatprep.subr.bf16.mxu1 %v2596_v39  ;;  %v790_v15 = vsel %vm788_vm3, %v776_v38, 0  ;;  %v2502_v38 = vld [vmem:[%s3417_s7 + $0x118] sm:$0xff]  }
 0x16a   :  { %768 = vmatmul.mubr.bf16.vlgmr.msra.gmra.mrb[4].mxu1 %v689_v37  ;;  %2292 = vmatpush3.bf16.msra.mxu0 %v2481_v50  ;;  %v2497_v37 = vld [vmem:[%s3417_s7 + $0x148] sm:$0xff]   ;;  %v2508_v50 = vld [vmem:[%s3417_s7 + $0x130] sm:$0xff]  }
 0x16b   :  { %2425 = vmatpush3.bf16.msra.mxu1 %v790_v15  ;;  %2426 = vmatprep.mubr.msk.bf16.mxu1 %vm2597_vm4, %v2596_v39  ;;  %v2503_v15 = vld [vmem:[%s3417_s7 + $0x160] sm:$0xff]  }
 0x16c   :  { %2259 = vmatprep.subr.bf16.mxu1 %v2472_v40  ;;  %2293 = vmatprep.subr.bf16.mxu0 %v2487_v30  ;;  %v2504_v40 = vld [vmem:[%s3417_s7 + $0x120] sm:$0xff]  }
 0x16e   :  { %2294 = vmatpush3.bf16.msra.mxu0 %v2489_v55 }
 0x16f   :  { %2295 = vmatprep.subr.bf16.mxu0 %v2491_v60  ;;  %v2513_v60 = vld [vmem:[%s3419_s9 + $0x10] sm:$0xff]  }
 0x172   :  { %2296 = vmatpush3.bf16.msra.mxu0 %v2493_v0  ;;  %v2514_v0 = vld [vmem:[%s3419_s9 + $0x18] sm:$0xff]  }
 0x173   :  { %2430 = vmatprep.subr.bf16.mxu0 %v2596_v39 }
 0x175   :  { %1330 = vmatmul.mubr.bf16.vlgmr.msra.gmra.mrb[64].mxu0 %v869_v45  ;;  %v2521_v45 = vld [vmem:[%s3421_s11] sm:$0xff]  }
 0x176   :  { %2438 = vmatprep.mubr.msk.bf16.mxu0 %vm2597_vm4, %v2596_v39  ;;  %2431 = vmatpush3.bf16.msra.mxu0 %v2511_v29  ;;  %v2547_v29 = vld [vmem:[%s3423_s13 + $0x94] ss:$8 sps:$4 sm:$0xff]  }
 0x177   :  { %2432 = vmatprep.subr.bf16.mxu0 %v2596_v39 }
 0x17a   :  { %2433 = vmatpush3.bf16.msra.mxu0 %v2512_v58  ;;  %v2545_v58 = vld [vmem:[%s3423_s13 + $0x90] ss:$8 sps:$4 sm:$0xff]  }
 0x17b   :  { %2434 = vmatprep.subr.bf16.mxu0 %v2596_v39 }
 0x17e   :  { %2435 = vmatpush3.bf16.msra.mxu0 %v2513_v60  ;;  %v2550_v60 = vld [vmem:[%s3423_s13 + $0xa4] ss:$8 sps:$4 sm:$0xff]  }
 0x17f   :  { %2436 = vmatprep.subr.bf16.mxu0 %v2596_v39 }
 0x182   :  { %2437 = vmatpush3.bf16.msra.mxu0 %v2514_v0  ;;  %v2548_v0 = vld [vmem:[%s3423_s13 + $0xa0] ss:$8 sps:$4 sm:$0xff]  }
 0x183   :  { %1663 = vmatprep.subr.bf16.mxu0 %v2517_v1  ;;  %v2553_v1 = vld [vmem:[%s3423_s13 + $0xb4] ss:$8 sps:$4 sm:$0xff]  }
 0x1fd   :  { %v2229_v3 = vpop.f32.mrb[0].mxu1 }
 0x1fe   :  { %v2230_v4 = vpop.f32.mrb[1].mxu1 }
 0x1ff   :  { %v2231_v5 = vadd.f32 %v2230_v4, %v2229_v3  ;;  %v2232_v44 = vpop.f32.mrb[2].mxu1  ;;  %v2523_v3 = vld [vmem:[%s3421_s11 + $0x10] ss:$0 sps:$4 sm:$0x77]  }
 0x200   :  { %v2233_v6 = vpop.f32.mrb[3].mxu1  ;;  %v1507_v4 = vsel %vm1505_vm6, %v2523_v3, 0  ;;  %v2555_v3 = vld [vmem:[%s3425_s15] sm:$0xff]  }
 0x23d   :  { %v2251_v7 = vpop.f32.mrb[4].mxu1 }
 0x23e   :  { %v2252_v46 = vpop.f32.mrb[5].mxu1 }
 0x23f   :  { %v2253_v11 = vadd.f32 %v2252_v46, %v2251_v7  ;;  %v2254_v12 = vpop.f32.mrb[6].mxu1 }
 0x240   :  { %v2255_v13 = vpop.f32.mrb[7].mxu1 }
 0x241   :  { %v770_v14 = vadd.f32 %v2253_v11, %v2231_v5 }
 0x243   :  { %v775_v18 = vpack.c.bf16 %v770_v14, %v770_v14 }
 0x245   :  { %2427 = vmatmul.mubr.msk.bf16.vlgmr.msra.gmra.mrb[8].mxu1 %vm784_vm5, %v775_v18 }
 0x246   :  { %2260 = vmatpush3.bf16.msra.mxu1 %v2473_v62  ;;  %1289 = vmatprep.mubr.bf16.mxu1 %v868_v17  ;;  %v2526_v62 = vld [vmem:[%s3423_s13 + $0x24] ss:$8 sps:$4 sm:$0xff]  }
 0x247   :  { %2261 = vmatprep.subr.bf16.mxu1 %v2474_v19 }
 0x248   :  { %v2297_v30 = vpop.f32.mrb[64].mxu0 }
 0x249   :  { %v2298_v54 = vpop.f32.mrb[65].mxu0 }
 0x24a   :  { %2262 = vmatpush3.bf16.msra.mxu1 %v2475_v20  ;;  %v2299_v55 = vadd.f32 %v2298_v54, %v2297_v30  ;;  %v2300_v56 = vpop.f32.mrb[66].mxu0  ;;  %v2124_v20 = vld [vmem:[%s3418_s8] ss:$0 sm:$0xff]  ;;  %v2541_v54 = vld [vmem:[%s3423_s13 + $0x74] ss:$8 sps:$4 sm:$0xff]   ;;  %s2601_s8 = smov [#allocation2]  }
 0x24b   :  { %2263 = vmatprep.subr.bf16.mxu1 %v2476_v59  ;;  %v2301_v57 = vpop.f32.mrb[67].mxu0  ;;  %v2544_v56 = vld [vmem:[%s3423_s13 + $0x84] ss:$8 sps:$4 sm:$0xff]   ;;  %s2029_s21 = sshll.u32 %s2601_s8, 4  ;;  %s2030_s21 = int_to_ptr.vmem [resolvable:$true] %s2029_s21 }
 0x24c   :  { %v2542_v57 = vld [vmem:[%s3423_s13 + $0x80] ss:$8 sps:$4 sm:$0xff]   ;;  %s2570_s22 = scalar_lea.vmem %s2030_s21, 32  ;;  %p2575_p1 = scmp.lt.s32.totalorder %s2030_s21, %s2030_s21 }
 0x24d   :  { %p2571_p0 = scmp.ne.s32.totalorder %s2030_s21, %s2570_s22  ;;  %p2576_p2 = scmp.lt.s32.totalorder %s2570_s22, %s2570_s22 }
 0x24e   :  { %2264 = vmatpush3.bf16.msra.mxu1 %v2477_v21 }
 0x24f   :  { %2265 = vmatprep.subr.bf16.mxu1 %v2478_v63  ;;  %p2577_p3 = por %p2576_p2, %p2575_p1 }
 0x251   :  { %p2578_p4 = pnand %p2577_p3, %p2571_p0 }
 0x252   :  { %2266 = vmatpush3.bf16.msra.mxu1 %v2479_v22 }
 0x253   :  { %2267 = vmatprep.subr.bf16.mxu1 %v2482_v23 }
 0x256   :  { %2268 = vmatpush3.bf16.msra.mxu1 %v2483_v61  ;;  %v2515_v61 = vld [vmem:[%s3423_s13] ss:$8 sps:$4 sm:$0xff]  }
 0x257   :  { %2269 = vmatprep.subr.bf16.mxu1 %v2484_v26 }
 0x25a   :  { %2270 = vmatpush3.bf16.msra.mxu1 %v2485_v27  ;;  %v2520_v27 = vld [vmem:[%s3423_s13 + $0x14] ss:$8 sps:$4 sm:$0xff]  }
 0x25b   :  { %2271 = vmatprep.subr.bf16.mxu1 %v2486_v28  ;;  %v2073_v28 = vld [vmem:[%s3416_s6] ss:$0 sm:$0xff] }
 0x25e   :  { %2272 = vmatpush3.bf16.msra.mxu1 %v2488_v10  ;;  %v2518_v10 = vld [vmem:[%s3423_s13 + $0x10] ss:$8 sps:$4 sm:$0xff]  }
 0x25f   :  { %2273 = vmatprep.subr.bf16.mxu1 %v2490_v31  ;;  %v2600_v31 = vmov 0  }
 0x262   :  { %2274 = vmatpush3.bf16.msra.mxu1 %v2492_v33 }
 0x263   :  { %2303 = vmatprep.subr.bf16.mxu1 %v2495_v9  ;;  %v2529_v9 = vld [vmem:[%s3423_s13 + $0x34] ss:$8 sps:$4 sm:$0xff]  }
 0x265   :  { %1290 = vmatmul.mubr.bf16.vlgmr.msra.gmra.mrb[12].mxu1 %v867_v35 }
 0x266   :  { %2304 = vmatpush3.bf16.msra.mxu1 %v2496_v16  ;;  %1369 = vmatprep.mubr.bf16.mxu1 %v872_v36  ;;  %v2527_v16 = vld [vmem:[%s3423_s13 + $0x30] ss:$8 sps:$4 sm:$0xff]   ;;  %v2532_v36 = vld [vmem:[%s3423_s13 + $0x44] ss:$8 sps:$4 sm:$0xff]  }
 0x267   :  { %2305 = vmatprep.subr.bf16.mxu1 %v2497_v37  ;;  %v2125_v37 = vld [vmem:[%s3420_s10] ss:$0 sm:$0xff] }
 0x26a   :  { %2306 = vmatpush3.bf16.msra.mxu1 %v2498_v48 }
 0x26b   :  { %2307 = vmatprep.subr.bf16.mxu1 %v2499_v25 }
 0x26e   :  { %2308 = vmatpush3.bf16.msra.mxu1 %v2500_v24 }
 0x26f   :  { %2309 = vmatprep.subr.bf16.mxu1 %v2501_v47 }
 0x272   :  { %2310 = vmatpush3.bf16.msra.mxu1 %v2502_v38  ;;  %v2530_v38 = vld [vmem:[%s3423_s13 + $0x40] ss:$8 sps:$4 sm:$0xff]  }
 0x273   :  { %2311 = vmatprep.subr.bf16.mxu1 %v2503_v15 }
 0x276   :  { %2312 = vmatpush3.bf16.msra.mxu1 %v2504_v40 }
 0x277   :  { %2313 = vmatprep.subr.bf16.mxu1 %v2505_v41  ;;  %v2535_v41 = vld [vmem:[%s3423_s13 + $0x54] ss:$8 sps:$4 sm:$0xff]  }
 0x27a   :  { %2314 = vmatpush3.bf16.msra.mxu1 %v2506_v43  ;;  %v2533_v43 = vld [vmem:[%s3423_s13 + $0x50] ss:$8 sps:$4 sm:$0xff]  }
 0x27b   :  { %2315 = vmatprep.subr.bf16.mxu1 %v2507_v49  ;;  %v2538_v49 = vld [vmem:[%s3423_s13 + $0x64] ss:$8 sps:$4 sm:$0xff]  }
 0x27e   :  { %2316 = vmatpush3.bf16.msra.mxu1 %v2508_v50 }
 0x27f   :  { %2317 = vmatprep.subr.bf16.mxu1 %v2509_v51 }
 0x282   :  { %2318 = vmatpush3.bf16.msra.mxu1 %v2510_v52 }
 0x283   :  { %2442 = vmatprep.subr.bf16.mxu1 %v2596_v39 }
 0x285   :  { %1370 = vmatmul.mubr.bf16.vlgmr.msra.gmra.mrb[16].mxu1 %v871_v53  ;;  %v2536_v53 = vld [vmem:[%s3423_s13 + $0x60] ss:$8 sps:$4 sm:$0xff]  }
 0x286   :  { %2448 = vmatprep.mubr.msk.bf16.mxu1 %vm2597_vm4, %v2596_v39  ;;  %2443 = vmatpush3.bf16.msra.mxu1 %v2521_v45  ;;  %v2551_v45 = vld [vmem:[%s3423_s13 + $0xb0] ss:$8 sps:$4 sm:$0xff]  }
 0x287   :  { %2444 = vmatprep.subr.bf16.mxu1 %v2596_v39 }
 0x28a   :  { %2445 = vmatpush3.bf16.msra.mxu1 %v2522_v2  ;;  %v2554_v2 = vld [vmem:[%s3425_s15 + $0x40] sm:$0xff]  }
 0x28b   :  { %2446 = vmatprep.subr.bf16.mxu1 %v2596_v39 }
 0x28e   :  { %2447 = vmatpush3.bf16.msra.mxu1 %v1507_v4  ;;  %v2556_v4 = vld [vmem:[%s3425_s15 + $0x48] sm:$0xff]  }
 0x28f   :  { %1599 = vmatprep.subr.bf16.mxu1 %v2526_v62 }
 0x318   :  { %v826_v5 = vpop.f32.mrb[8].mxu1 }
 0x319   :  { %v2428_v44 = vpop.f32.mrb[9].mxu1  ;;  %v827_v32 = vadd.f32 %v2073_v28, %v826_v5  ;;  %v2557_v5 = vld [vmem:[%s3425_s15 + $0x8] sm:$0xff]  }
 0x31a   :  { %v829_v6 = vpop.f32.mrb[10].mxu1  ;;  %v2558_v44 = vld [vmem:[%s3425_s15 + $0x50] sm:$0xff]  }
 0x31b   :  { %v2429_v7 = vpop.f32.mrb[11].mxu1  ;;  %v1573_v33 = vpack.c.bf16 %v827_v32, %v827_v32  ;;  %v2559_v6 = vld [vmem:[%s3425_s15 + $0x10] sm:$0xff]   ;;  %v1828_v32 = vld [vmem:[%s3424_s14] sm:$0x3] }
 0x31c   :  { %v2560_v7 = vld [vmem:[%s3425_s15 + $0x58] sm:$0xff]  }
 0x338   :  { %v2275_v46 = vpop.f32.mrb[12].mxu1 }
 0x339   :  { %v2276_v8 = vpop.f32.mrb[13].mxu1 }
 0x33a   :  { %v2277_v11 = vadd.f32 %v2276_v8, %v2275_v46  ;;  %v2278_v12 = vpop.f32.mrb[14].mxu1  ;;  %v2561_v46 = vld [vmem:[%s3425_s15 + $0x18] sm:$0xff]   ;;  %v2562_v8 = vld [vmem:[%s3425_s15 + $0x60] sm:$0xff]  }
 0x33b   :  { %v2279_v13 = vpop.f32.mrb[15].mxu1  ;;  %v2564_v12 = vld [vmem:[%s3425_s15 + $0x68] sm:$0xff]  }
 0x33c   :  { %v1332_v14 = vadd.f32 %v2299_v55, %v2277_v11  ;;  %v2539_v55 = vld [vmem:[%s3423_s13 + $0x70] ss:$8 sps:$4 sm:$0xff]   ;;  %v2563_v11 = vld [vmem:[%s3425_s15 + $0x20] sm:$0xff]  }
 0x33d   :  { %v2131_v13 = vld [vmem:[%s3422_s12] ss:$0 sm:$0xff] }
 0x358   :  { %v2319_v17 = vpop.f32.mrb[16].mxu1 }
 0x359   :  { %v2320_v18 = vpop.f32.mrb[17].mxu1 }
 0x35a   :  { %v2321_v39 = vadd.f32 %v2320_v18, %v2319_v17  ;;  %v2322_v19 = vpop.f32.mrb[18].mxu1 }
 0x35b   :  { %v2323_v59 = vpop.f32.mrb[19].mxu1 }
 0x35c   :  { %v1372_v21 = vadd.f32 %v2321_v39, %v1332_v14  ;;  %v2566_v59 = vld [vmem:[%s3425_s15 + $0x70] sm:$0xff]  }
 0x35e   :  { %v1384_v63 = vadd.f32 %v2124_v20, %v1372_v21  ;;  %v1470_v22 = vpack.c.bf16 %v1372_v21, %v1372_v21  ;;  %v2565_v20 = vld [vmem:[%s3425_s15 + $0x28] sm:$0xff]   ;;  %v2567_v21 = vld [vmem:[%s3425_s15 + $0x30] sm:$0xff]  }
 0x360   :  { %v1385_v23 = vmax.f32 %v1384_v63, 0.0  ;;  %1484 = vrot.lane.b32.xlu0 %v1470_v22, %s2599_s29  ;;  %v2568_v63 = vld [vmem:[%s3425_s15 + $0x78] sm:$0xff]  }
 0x361   :  { %v2569_v22 = vld [vmem:[%s3425_s15 + $0x38] sm:$0xff]  }
 0x362   :  { %v1386_v26 = vpack.c.bf16 %v1385_v23, %v1385_v23 }
 0x364   :  { %2439 = vmatmul.mubr.msk.bf16.vlgmr.msra.gmra.mrb[68].mxu0 %vm1426_vm7, %v1386_v26 }
 0x365   :  { %1664 = vmatpush1.bf16.msra.mxu0 %v2515_v61  ;;  %1695 = vmatprep.mubr.bf16.mxu0 %v2600_v31 }
 0x366   :  { %1665 = vmatprep.subr.bf16.mxu0 %v2520_v27 }
 0x369   :  { %1666 = vmatpush1.bf16.msra.mxu0 %v2518_v10 }
 0x36a   :  { %2334 = vmatprep.subr.bf16.mxu0 %v2554_v2 }
 0x36c   :  { %2145 = vmatmul.mubr.msk.bf16.vlgmr.msra.gmra.mrb[72].mxu0 %vm1595_vm8, %v1573_v33  ;;  %v1836_v33 = vsub.s32 1, %v2922_v42 }
 0x36d   :  { %2335 = vmatpush3.bf16.msra.mxu0 %v2555_v3 }
 0x36e   :  { %2336 = vmatprep.subr.bf16.mxu0 %v2556_v4 }
 0x371   :  { %2337 = vmatpush3.bf16.msra.mxu0 %v2557_v5 }
 0x372   :  { %2338 = vmatprep.subr.bf16.mxu0 %v2558_v44 }
 0x375   :  { %2339 = vmatpush3.bf16.msra.mxu0 %v2559_v6 }
 0x376   :  { %2340 = vmatprep.subr.bf16.mxu0 %v2560_v7 }
 0x379   :  { %2341 = vmatpush3.bf16.msra.mxu0 %v2561_v46 }
 0x37a   :  { %2342 = vmatprep.subr.bf16.mxu0 %v2562_v8 }
 0x37d   :  { %2343 = vmatpush3.bf16.msra.mxu0 %v2563_v11 }
 0x37e   :  { %2344 = vmatprep.subr.bf16.mxu0 %v2564_v12 }
 0x381   :  { %2345 = vmatpush3.bf16.msra.mxu0 %v2565_v20 }
 0x382   :  { %2346 = vmatprep.subr.bf16.mxu0 %v2566_v59 }
 0x385   :  { %2347 = vmatpush3.bf16.msra.mxu0 %v2567_v21 }
 0x386   :  { %2348 = vmatprep.subr.bf16.mxu0 %v2568_v63 }
 0x389   :  { %2349 = vmatpush3.bf16.msra.mxu0 %v2569_v22 }
 0x3d2   :  { %v1485_v35 = vpop.permute.xlu0 %1484 }
 0x3d3   :  { %2449 = vmatmul.mubr.msk.bf16.vlgmr.msra.gmra.mrb[20].mxu1 %vm1501_vm9, %v1485_v35  ;;  %v1837_v35 = vrot.slane %v1828_v32, %v1836_v33 }
 0x3d4   :  { %1600 = vmatpush1.bf16.msra.mxu1 %v2524_v34  ;;  %1631 = vmatprep.mubr.bf16.mxu1 %v2600_v31 }
 0x3d5   :  { %1601 = vmatprep.subr.bf16.mxu1 %v2529_v9 }
 0x3d8   :  { %1602 = vmatpush1.bf16.msra.mxu1 %v2527_v16 }
 0x3d9   :  { %1785 = vmatprep.subr.bf16.mxu1 %v2532_v36 }
 0x437   :  { %v1464_v48 = vpop.f32.mrb[68].mxu0 }
 0x438   :  { %v1465_v25 = vadd.f32 %v2125_v37, %v1464_v48  ;;  %v2440_v24 = vpop.f32.mrb[69].mxu0 }
 0x439   :  { %v1467_v47 = vpop.f32.mrb[70].mxu0 }
 0x43a   :  { %v1574_v15 = vpack.c.bf16 %v1465_v25, %v1465_v25  ;;  %v2441_v40 = vpop.f32.mrb[71].mxu0 }
 0x43c   :  { %2140 = vmatmul.mubr.msk.bf16.vlgmr.msra.gmra.mrb[24].mxu1 %vm1595_vm8, %v1574_v15 }
 0x43d   :  { %1786 = vmatpush1.bf16.msra.mxu1 %v2530_v38  ;;  %1817 = vmatprep.mubr.bf16.mxu1 %v2600_v31  ;;  %v1832_v31 = vsub.s32 0, %v2922_v42  ;;  %v2162_v42 = vld [vmem:[%s3426_s16] ss:$0 sm:$0xff] }
 0x43e   :  { %1787 = vmatprep.subr.bf16.mxu1 %v2535_v41 }
 0x43f   :  { %v3300_v50 = vpop.f32.mrb[72].mxu0  ;;  %v1833_v34 = vrot.slane %v1828_v32, %v1832_v31 }
 0x440   :  { %v3302_v51 = vpop.f32.mrb[73].mxu0 }
 0x441   :  { %v1701_v52 = vpop.f32.mrb[74].mxu0  ;;  %1788 = vmatpush1.bf16.msra.mxu1 %v2533_v43 }
 0x442   :  { %v1702_v30 = vpop.f32.mrb[75].mxu0  ;;  %1789 = vmatprep.subr.bf16.mxu1 %v2538_v49 }
 0x445   :  { %1790 = vmatpush1.bf16.msra.mxu1 %v2536_v53 }
 0x446   :  { %1791 = vmatprep.subr.bf16.mxu1 %v2541_v54 }
 0x449   :  { %1792 = vmatpush1.bf16.msra.mxu1 %v2539_v55 }
 0x44a   :  { %1793 = vmatprep.subr.bf16.mxu1 %v2544_v56 }
 0x44d   :  { %1794 = vmatpush1.bf16.msra.mxu1 %v2542_v57 }
 0x44e   :  { %1795 = vmatprep.subr.bf16.mxu1 %v2547_v29 }
 0x451   :  { %1796 = vmatpush1.bf16.msra.mxu1 %v2545_v58 }
 0x452   :  { %1797 = vmatprep.subr.bf16.mxu1 %v2550_v60 }
 0x455   :  { %1798 = vmatpush1.bf16.msra.mxu1 %v2548_v0 }
 0x456   :  { %1799 = vmatprep.subr.bf16.mxu1 %v2553_v1 }
 0x459   :  { %1800 = vmatpush1.bf16.msra.mxu1 %v2551_v45 }
 0x4a6   :  { %v1543_v14 = vpop.f32.mrb[20].mxu1 }
 0x4a7   :  { %v1544_v62 = vadd.f32 %v2131_v13, %v1543_v14  ;;  %v2450_v17 = vpop.f32.mrb[21].mxu1 }
 0x4a8   :  { %v1546_v18 = vpop.f32.mrb[22].mxu1 }
 0x4a9   :  { %v1704_v39 = vpack.c.bf16 %v1544_v62, %v1544_v62  ;;  %v2451_v19 = vpop.f32.mrb[23].mxu1 }
 0x4ab   :  { %1818 = vmatmul.mubr.bf16.vlgmr.msra.gmra.mrb[28].mxu1 %v1704_v39 }
 0x50f   :  { %v1633_v23 = vpop.f32.mrb[24].mxu1 }
 0x510   :  { %v1698_v61 = vadd.f32 %v3300_v50, %v1633_v23  ;;  %v1635_v26 = vpop.f32.mrb[25].mxu1 }
 0x511   :  { %v1700_v27 = vadd.f32 %v3302_v51, %v1635_v26  ;;  %v1637_v28 = vpop.f32.mrb[26].mxu1 }
 0x512   :  { %v1638_v10 = vpop.f32.mrb[27].mxu1 }
 0x57e   :  { %v1819_v9 = vpop.f32.mrb[28].mxu1 }
 0x57f   :  { %v1826_v16 = vadd.f32 %v1819_v9, %v1698_v61  ;;  %v1821_v36 = vpop.f32.mrb[29].mxu1 }
 0x580   :  { %v1827_v37 = vadd.f32 %v1821_v36, %v1700_v27  ;;  %v1823_v48 = vpop.f32.mrb[30].mxu1 }
 0x581   :  { %v1840_v25 = vadd.f32 %v1833_v34, %v1826_v16  ;;  %v1824_v24 = vpop.f32.mrb[31].mxu1 }
 0x582   :  { %v1841_v47 = vadd.f32 %v1837_v35, %v1827_v37 }
 0x583   :  { %v1842_v38 = vmax.f32 %v1840_v25, 0.0 }
 0x584   :  { %v1843_v15 = vmax.f32 %v1841_v47, 0.0 }
 0x585   :  { %v1844_v41 = vpack.c.bf16 %v1842_v38, %v1842_v38 }
 0x586   :  { %v1845_v40 = vpack.c.bf16 %v1843_v15, %v1843_v15 }
 0x588   :  { %2013 = vmatprep.mubr.bf16.mxu0 %v1845_v40 }
 0x589   :  { %2014 = vmatmul.mubr.bf16.vlgmr.msra.gmra.mrb[76].mxu0 %v1844_v41 }
 0x65c   :  { %v2350_v43 = vpop.f32.mrb[76].mxu0 }
 0x65d   :  { %v2351_v49 = vpop.f32.mrb[77].mxu0 }
 0x65e   :  { %v2352_v50 = vadd.f32 %v2351_v49, %v2350_v43  ;;  %v2353_v51 = vpop.f32.mrb[78].mxu0 }
 0x65f   :  { %v2354_v52 = vpop.f32.mrb[79].mxu0 }
 0x660   :  { %v2016_v53 = vadd.f32 %v2352_v50, %v2162_v42 }
 0x662   :  { %2022 = vst.msk [vmem:[#allocation2] sm:$0x3] %vm2021_vm10, %v2016_v53 }
 0x663   :  { %2581 = shalt.err (!%p2578_p4)
}
 0x664   :  { %s2582_s16 = scalar_lea.hbm %s3427_s17, 32 }
 0x665   :  { %p2583_p5 = scmp.ne.s32.totalorder %s3427_s17, %s2582_s16  ;;  %p2586_p6 = scmp.lt.u32.totalorder %s2582_s16, %s3427_s17 }
 0x667   :  { %p2588_p7 = pnand %p2586_p6, %p2583_p5 }
 0x669   :  { %2591 = shalt.err (!%p2588_p7)
}
 0x66a   :  { %2032 = dma.vmem_to_hbm [thread:$0]  %s2030_s21, 32, %s3427_s17, [#allocation3]  }
 0x66b   :  { %2592 = dma.done.wait [#allocation3], 32  }
 0x66c   :  { %2593 = vsyncadd [#allocation3], 4294967264 }
 0x66d   :  { %2036 = vsyncpa [#allocation3], 1 }

</bundles_post_ra>
